<compile_context>
chip_gen: v6e
topology: v6e:2x2x1
jax: 0.10.0
libtpu: 0.0.40
codegen_flags: <defaults>
</compile_context>

<pallas_src>
import jax
import jax.numpy as jnp
from jax.experimental import pallas as pl
from jax.experimental.pallas import tpu as pltpu


def _round_up(v, m):
    return (v + m - 1) // m * m


def conv_block_forward(x_nchw, weight_oihw, bias, *, stride=1, padding=1,
                       compute_dtype=jnp.bfloat16):
    """ConvBlock.forward: ReLU(Conv2d(x)) with PyTorch NCHW/OIHW conventions."""
    # TODO(synk): only stride=1 (the module default used here) is implemented.
    assert stride == 1, "only stride=1 implemented"
    N, Cin, H, W = x_nchw.shape
    Cout, Cin_w, KH, KW = weight_oihw.shape
    assert Cin == Cin_w
    Hp, Wp = H + 2 * padding, W + 2 * padding
    Ho, Wo = Hp - KH + 1, Wp - KW + 1
    assert Ho > 0 and Wo > 0, "kernel larger than padded input"

    # Width is extended by KW-1 zero columns so a tap shift (kh, kw) on the
    # row-flattened image is a single contiguous row offset kh*Wpp + kw.
    Wpp = Wp + (KW - 1)
    M_out = Ho * Wpp                      # rows computed per image (cols >= Wo dropped later)
    R_need = Hp * Wpp + (KW - 1)          # rows the largest tap offset reaches
    R_in = _round_up(R_need, 8)

    # ---- wrapper glue (tiny XLA ops): NCHW -> padded NHWC -> flattened rows ----
    # TODO(synk): keep activations in this layout across chained ConvBlocks so the
    # transpose/pad only happens once at the network boundary.
    x = jnp.transpose(x_nchw, (0, 2, 3, 1))                                   # (N, H, W, Cin)
    x = jnp.pad(x, ((0, 0), (padding, padding), (padding, padding + KW - 1), (0, 0)))
    x = x.reshape(N, Hp * Wpp, Cin)
    x = jnp.pad(x, ((0, 0), (0, R_in - Hp * Wpp), (0, 0)))
    x = x.astype(compute_dtype)                                               # bf16 MXU operand

    # Weights: OIHW -> (KH*KW, Cin, Cout); no banded redundancy.
    # TODO(synk): if weights are fixed across calls, hoist this transform out of
    # the per-call jit path.
    w = jnp.transpose(weight_oihw, (2, 3, 1, 0)).reshape(KH * KW, Cin, Cout)
    w = w.astype(compute_dtype)
    b = bias.astype(jnp.float32).reshape(1, Cout)

    out_dtype = x_nchw.dtype   # keep f32 output (module semantics); bf16 writeback optional.

    def kernel(x_ref, w_ref, b_ref, o_ref):
        # x_ref: (1, R_in, Cin) bf16 -- one full (row-flattened) padded image.
        # w_ref: (KH*KW, Cin, Cout) bf16, grid-invariant (VMEM-resident).
        # b_ref: (1, Cout) f32, grid-invariant.
        # o_ref: (1, M_out, Cout) f32.
        acc = jnp.zeros((M_out, Cout), jnp.float32)
        # KH*KW is tiny -> static unroll.  Tap offsets are compile-time constants;
        # the sublane-misaligned ones cost one shift-copy each, amortized over the
        # M_out(>=128)-row GEMM.
        # TODO(synk): for larger Cin, concatenate the KH*KW tap slices on the lane
        # axis and run a single K = KH*KW*Cin GEMM to fill the MXU depth better.
        for kh in range(KH):
            for kw in range(KW):
                off = kh * Wpp + kw
                lhs = x_ref[0, pl.ds(off, M_out), :]             # (M_out, Cin) bf16
                acc = acc + jnp.dot(lhs, w_ref[kh * KW + kw],
                                    preferred_element_type=jnp.float32)
        acc = jnp.maximum(acc + b_ref[...], 0.0)                 # bias + ReLU in f32
        # NOTE: output minor dim = Cout (masked stores when Cout < 128); it becomes
        # lane-dense automatically at realistic channel counts (Cout >= 128).
        o_ref[0] = acc.astype(o_ref.dtype)

    # ---- true cost estimate (no banded inflation) ----
    itemsize_c = jnp.dtype(compute_dtype).itemsize
    itemsize_o = jnp.dtype(out_dtype).itemsize
    flops = 2 * N * M_out * KH * KW * Cin * Cout
    bytes_accessed = (N * R_in * Cin * itemsize_c
                      + KH * KW * Cin * Cout * itemsize_c
                      + Cout * 4
                      + N * M_out * Cout * itemsize_o)

    # ---- explicit VMEM budget from the real (sublane/lane padded) block sizes ----
    def _blk_bytes(lead, sub, lane, isz):
        return lead * _round_up(sub, 8) * _round_up(lane, 128) * isz
    x_blk = _blk_bytes(1, R_in, Cin, itemsize_c)
    w_blk = _blk_bytes(KH * KW, Cin, Cout, itemsize_c)
    b_blk = _blk_bytes(1, 1, Cout, 4)
    o_blk = _blk_bytes(1, M_out, Cout, itemsize_o)
    vmem_limit = 2 * (x_blk + w_blk + b_blk + o_blk) + 2 * o_blk + (4 << 20)
    vmem_limit = int(min(max(vmem_limit, 16 << 20), 48 << 20))   # headroom under v7x's 64 MiB

    out = pl.pallas_call(
        kernel,
        out_shape=jax.ShapeDtypeStruct((N, M_out, Cout), out_dtype),
        grid=(N,),
        in_specs=[
            pl.BlockSpec((1, R_in, Cin), lambda n: (n, 0, 0)),
            pl.BlockSpec((KH * KW, Cin, Cout), lambda n: (0, 0, 0)),   # resident
            pl.BlockSpec((1, Cout), lambda n: (0, 0)),                 # resident
        ],
        out_specs=pl.BlockSpec((1, M_out, Cout), lambda n: (n, 0, 0)),
        compiler_params=pltpu.CompilerParams(
            dimension_semantics=("parallel",),
            vmem_limit_bytes=vmem_limit),
        cost_estimate=pl.CostEstimate(
            flops=flops, transcendentals=0, bytes_accessed=int(bytes_accessed)),
    )(x, w, b)

    # Drop the KW-1 (+pad) garbage columns and return NCHW.
    out = out.reshape(N, Ho, Wpp, Cout)[:, :, :Wo, :]
    return jnp.transpose(out, (0, 3, 1, 2))
    # TODO(synk): for large images add a row-tile grid axis (element-offset
    # window on the flattened-row axis) so the resident x block stays small.


if __name__ == "__main__":
    key = jax.random.PRNGKey(0)
    kx, kw_key, kb = jax.random.split(key, 3)

    # ConvBlock(in_channels=4, out_channels=8, kernel_size=3, stride=1, padding=1)
    N, Cin, H, W = 2, 4, 16, 16
    Cout, K = 8, 3

    x = jax.random.normal(kx, (N, Cin, H, W), jnp.float32)

    # deterministic PyTorch-style init: U(-1/sqrt(fan_in), 1/sqrt(fan_in))
    fan_in = Cin * K * K
    bound = 1.0 / (fan_in ** 0.5)
    weight = jax.random.uniform(kw_key, (Cout, Cin, K, K), jnp.float32, -bound, bound)
    bias = jax.random.uniform(kb, (Cout,), jnp.float32, -bound, bound)

    fwd = jax.jit(lambda a, w, b: conv_block_forward(a, w, b, stride=1, padding=1))
    out = jax.block_until_ready(fwd(x, weight, bias))

    # Reference: XLA conv + bias + ReLU on the same bf16-quantized operands
    # (the kernel feeds bf16 to the MXU and accumulates in f32).
    xq = x.astype(jnp.bfloat16).astype(jnp.float32)
    wq = weight.astype(jnp.bfloat16).astype(jnp.float32)
    ref = jax.lax.conv_general_dilated(
        xq, wq, window_strides=(1, 1), padding=((1, 1), (1, 1)),
        dimension_numbers=("NCHW", "OIHW", "NCHW"),
        precision=jax.lax.Precision.HIGHEST)
    ref = jnp.maximum(ref + bias.reshape(1, Cout, 1, 1), 0.0)

    assert out.shape == (N, Cout, H, W), out.shape
    assert jnp.allclose(out, ref, atol=2e-3, rtol=2e-3), \
        float(jnp.max(jnp.abs(out - ref)))
    print("KERNEL_OK")
</pallas_src>

<mosaic_0001>
module attributes {stable_mosaic.version = 11 : i64} {
  func.func @kernel(%arg0: i32, %arg1: memref<1x368x4xbf16, #tpu.memory_space<vmem>>, %arg2: memref<9x4x8xbf16, #tpu.memory_space<vmem>>, %arg3: memref<1x8xf32, #tpu.memory_space<vmem>>, %arg4: memref<1x320x8xf32, #tpu.memory_space<vmem>>) attributes {dimension_semantics = [#tpu.dimension_semantics<parallel>], iteration_bounds = array<i64: 2>, scalar_prefetch = 0 : i64, scratch_operands = 0 : i64, tpu.core_type = #tpu.core_type<tc>, window_params = [{transform_indices = @transform_0, window_bounds = array<i64: 1, 368, 4>}, {pipeline_mode = #tpu.pipeline_mode<synchronous>, transform_indices = @transform_1, window_bounds = array<i64: 9, 4, 8>}, {pipeline_mode = #tpu.pipeline_mode<synchronous>, transform_indices = @transform_2, window_bounds = array<i64: 1, 8>}, {transform_indices = @transform_3, window_bounds = array<i64: 1, 320, 8>}]} {
    %cst = arith.constant 0.000000e+00 : f32
    %0 = vector.broadcast %cst : f32 to vector<320x8xf32>
    %c0 = arith.constant 0 : index
    %c0_0 = arith.constant 0 : index
    %c0_1 = arith.constant 0 : index
    %1 = vector.load %arg1[%c0, %c0_0, %c0_1] : memref<1x368x4xbf16, #tpu.memory_space<vmem>>, vector<1x320x4xbf16>
    %2 = vector.shape_cast %1 : vector<1x320x4xbf16> to vector<320x4xbf16>
    %c0_2 = arith.constant 0 : index
    %c0_3 = arith.constant 0 : index
    %c0_4 = arith.constant 0 : index
    %3 = vector.load %arg2[%c0_2, %c0_3, %c0_4] : memref<9x4x8xbf16, #tpu.memory_space<vmem>>, vector<1x4x8xbf16>
    %4 = vector.shape_cast %3 : vector<1x4x8xbf16> to vector<4x8xbf16>
    %cst_5 = arith.constant dense<0.000000e+00> : vector<320x8xf32>
    %5 = tpu.matmul %2, %4, %cst_5 {dimension_numbers = #tpu.dot_dimension_numbers<[1], [0], [0], [1], [0, 0, 1, 1], [], []>} : vector<320x4xbf16>, vector<4x8xbf16>, vector<320x8xf32> -> vector<320x8xf32>
    %6 = arith.addf %0, %5 : vector<320x8xf32>
    %c0_6 = arith.constant 0 : index
    %c1 = arith.constant 1 : index
    %c0_7 = arith.constant 0 : index
    %7 = vector.load %arg1[%c0_6, %c1, %c0_7] : memref<1x368x4xbf16, #tpu.memory_space<vmem>>, vector<1x320x4xbf16>
    %8 = vector.shape_cast %7 : vector<1x320x4xbf16> to vector<320x4xbf16>
    %c1_8 = arith.constant 1 : index
    %c0_9 = arith.constant 0 : index
    %c0_10 = arith.constant 0 : index
    %9 = vector.load %arg2[%c1_8, %c0_9, %c0_10] : memref<9x4x8xbf16, #tpu.memory_space<vmem>>, vector<1x4x8xbf16>
    %10 = vector.shape_cast %9 : vector<1x4x8xbf16> to vector<4x8xbf16>
    %cst_11 = arith.constant dense<0.000000e+00> : vector<320x8xf32>
    %11 = tpu.matmul %8, %10, %cst_11 {dimension_numbers = #tpu.dot_dimension_numbers<[1], [0], [0], [1], [0, 0, 1, 1], [], []>} : vector<320x4xbf16>, vector<4x8xbf16>, vector<320x8xf32> -> vector<320x8xf32>
    %12 = arith.addf %6, %11 : vector<320x8xf32>
    %c0_12 = arith.constant 0 : index
    %c2 = arith.constant 2 : index
    %c0_13 = arith.constant 0 : index
    %13 = vector.load %arg1[%c0_12, %c2, %c0_13] : memref<1x368x4xbf16, #tpu.memory_space<vmem>>, vector<1x320x4xbf16>
    %14 = vector.shape_cast %13 : vector<1x320x4xbf16> to vector<320x4xbf16>
    %c2_14 = arith.constant 2 : index
    %c0_15 = arith.constant 0 : index
    %c0_16 = arith.constant 0 : index
    %15 = vector.load %arg2[%c2_14, %c0_15, %c0_16] : memref<9x4x8xbf16, #tpu.memory_space<vmem>>, vector<1x4x8xbf16>
    %16 = vector.shape_cast %15 : vector<1x4x8xbf16> to vector<4x8xbf16>
    %cst_17 = arith.constant dense<0.000000e+00> : vector<320x8xf32>
    %17 = tpu.matmul %14, %16, %cst_17 {dimension_numbers = #tpu.dot_dimension_numbers<[1], [0], [0], [1], [0, 0, 1, 1], [], []>} : vector<320x4xbf16>, vector<4x8xbf16>, vector<320x8xf32> -> vector<320x8xf32>
    %18 = arith.addf %12, %17 : vector<320x8xf32>
    %c0_18 = arith.constant 0 : index
    %c20 = arith.constant 20 : index
    %c0_19 = arith.constant 0 : index
    %19 = vector.load %arg1[%c0_18, %c20, %c0_19] : memref<1x368x4xbf16, #tpu.memory_space<vmem>>, vector<1x320x4xbf16>
    %20 = vector.shape_cast %19 : vector<1x320x4xbf16> to vector<320x4xbf16>
    %c3 = arith.constant 3 : index
    %c0_20 = arith.constant 0 : index
    %c0_21 = arith.constant 0 : index
    %21 = vector.load %arg2[%c3, %c0_20, %c0_21] : memref<9x4x8xbf16, #tpu.memory_space<vmem>>, vector<1x4x8xbf16>
    %22 = vector.shape_cast %21 : vector<1x4x8xbf16> to vector<4x8xbf16>
    %cst_22 = arith.constant dense<0.000000e+00> : vector<320x8xf32>
    %23 = tpu.matmul %20, %22, %cst_22 {dimension_numbers = #tpu.dot_dimension_numbers<[1], [0], [0], [1], [0, 0, 1, 1], [], []>} : vector<320x4xbf16>, vector<4x8xbf16>, vector<320x8xf32> -> vector<320x8xf32>
    %24 = arith.addf %18, %23 : vector<320x8xf32>
    %c0_23 = arith.constant 0 : index
    %c21 = arith.constant 21 : index
    %c0_24 = arith.constant 0 : index
    %25 = vector.load %arg1[%c0_23, %c21, %c0_24] : memref<1x368x4xbf16, #tpu.memory_space<vmem>>, vector<1x320x4xbf16>
    %26 = vector.shape_cast %25 : vector<1x320x4xbf16> to vector<320x4xbf16>
    %c4 = arith.constant 4 : index
    %c0_25 = arith.constant 0 : index
    %c0_26 = arith.constant 0 : index
    %27 = vector.load %arg2[%c4, %c0_25, %c0_26] : memref<9x4x8xbf16, #tpu.memory_space<vmem>>, vector<1x4x8xbf16>
    %28 = vector.shape_cast %27 : vector<1x4x8xbf16> to vector<4x8xbf16>
    %cst_27 = arith.constant dense<0.000000e+00> : vector<320x8xf32>
    %29 = tpu.matmul %26, %28, %cst_27 {dimension_numbers = #tpu.dot_dimension_numbers<[1], [0], [0], [1], [0, 0, 1, 1], [], []>} : vector<320x4xbf16>, vector<4x8xbf16>, vector<320x8xf32> -> vector<320x8xf32>
    %30 = arith.addf %24, %29 : vector<320x8xf32>
    %c0_28 = arith.constant 0 : index
    %c22 = arith.constant 22 : index
    %c0_29 = arith.constant 0 : index
    %31 = vector.load %arg1[%c0_28, %c22, %c0_29] : memref<1x368x4xbf16, #tpu.memory_space<vmem>>, vector<1x320x4xbf16>
    %32 = vector.shape_cast %31 : vector<1x320x4xbf16> to vector<320x4xbf16>
    %c5 = arith.constant 5 : index
    %c0_30 = arith.constant 0 : index
    %c0_31 = arith.constant 0 : index
    %33 = vector.load %arg2[%c5, %c0_30, %c0_31] : memref<9x4x8xbf16, #tpu.memory_space<vmem>>, vector<1x4x8xbf16>
    %34 = vector.shape_cast %33 : vector<1x4x8xbf16> to vector<4x8xbf16>
    %cst_32 = arith.constant dense<0.000000e+00> : vector<320x8xf32>
    %35 = tpu.matmul %32, %34, %cst_32 {dimension_numbers = #tpu.dot_dimension_numbers<[1], [0], [0], [1], [0, 0, 1, 1], [], []>} : vector<320x4xbf16>, vector<4x8xbf16>, vector<320x8xf32> -> vector<320x8xf32>
    %36 = arith.addf %30, %35 : vector<320x8xf32>
    %c0_33 = arith.constant 0 : index
    %c40 = arith.constant 40 : index
    %c0_34 = arith.constant 0 : index
    %37 = vector.load %arg1[%c0_33, %c40, %c0_34] : memref<1x368x4xbf16, #tpu.memory_space<vmem>>, vector<1x320x4xbf16>
    %38 = vector.shape_cast %37 : vector<1x320x4xbf16> to vector<320x4xbf16>
    %c6 = arith.constant 6 : index
    %c0_35 = arith.constant 0 : index
    %c0_36 = arith.constant 0 : index
    %39 = vector.load %arg2[%c6, %c0_35, %c0_36] : memref<9x4x8xbf16, #tpu.memory_space<vmem>>, vector<1x4x8xbf16>
    %40 = vector.shape_cast %39 : vector<1x4x8xbf16> to vector<4x8xbf16>
    %cst_37 = arith.constant dense<0.000000e+00> : vector<320x8xf32>
    %41 = tpu.matmul %38, %40, %cst_37 {dimension_numbers = #tpu.dot_dimension_numbers<[1], [0], [0], [1], [0, 0, 1, 1], [], []>} : vector<320x4xbf16>, vector<4x8xbf16>, vector<320x8xf32> -> vector<320x8xf32>
    %42 = arith.addf %36, %41 : vector<320x8xf32>
    %c0_38 = arith.constant 0 : index
    %c41 = arith.constant 41 : index
    %c0_39 = arith.constant 0 : index
    %43 = vector.load %arg1[%c0_38, %c41, %c0_39] : memref<1x368x4xbf16, #tpu.memory_space<vmem>>, vector<1x320x4xbf16>
    %44 = vector.shape_cast %43 : vector<1x320x4xbf16> to vector<320x4xbf16>
    %c7 = arith.constant 7 : index
    %c0_40 = arith.constant 0 : index
    %c0_41 = arith.constant 0 : index
    %45 = vector.load %arg2[%c7, %c0_40, %c0_41] : memref<9x4x8xbf16, #tpu.memory_space<vmem>>, vector<1x4x8xbf16>
    %46 = vector.shape_cast %45 : vector<1x4x8xbf16> to vector<4x8xbf16>
    %cst_42 = arith.constant dense<0.000000e+00> : vector<320x8xf32>
    %47 = tpu.matmul %44, %46, %cst_42 {dimension_numbers = #tpu.dot_dimension_numbers<[1], [0], [0], [1], [0, 0, 1, 1], [], []>} : vector<320x4xbf16>, vector<4x8xbf16>, vector<320x8xf32> -> vector<320x8xf32>
    %48 = arith.addf %42, %47 : vector<320x8xf32>
    %c0_43 = arith.constant 0 : index
    %c42 = arith.constant 42 : index
    %c0_44 = arith.constant 0 : index
    %49 = vector.load %arg1[%c0_43, %c42, %c0_44] : memref<1x368x4xbf16, #tpu.memory_space<vmem>>, vector<1x320x4xbf16>
    %50 = vector.shape_cast %49 : vector<1x320x4xbf16> to vector<320x4xbf16>
    %c8 = arith.constant 8 : index
    %c0_45 = arith.constant 0 : index
    %c0_46 = arith.constant 0 : index
    %51 = vector.load %arg2[%c8, %c0_45, %c0_46] : memref<9x4x8xbf16, #tpu.memory_space<vmem>>, vector<1x4x8xbf16>
    %52 = vector.shape_cast %51 : vector<1x4x8xbf16> to vector<4x8xbf16>
    %cst_47 = arith.constant dense<0.000000e+00> : vector<320x8xf32>
    %53 = tpu.matmul %50, %52, %cst_47 {dimension_numbers = #tpu.dot_dimension_numbers<[1], [0], [0], [1], [0, 0, 1, 1], [], []>} : vector<320x4xbf16>, vector<4x8xbf16>, vector<320x8xf32> -> vector<320x8xf32>
    %54 = arith.addf %48, %53 : vector<320x8xf32>
    %c0_48 = arith.constant 0 : index
    %c0_49 = arith.constant 0 : index
    %55 = vector.load %arg3[%c0_48, %c0_49] : memref<1x8xf32, #tpu.memory_space<vmem>>, vector<1x8xf32>
    %56 = vector.broadcast %55 : vector<1x8xf32> to vector<320x8xf32>
    %57 = arith.addf %54, %56 : vector<320x8xf32>
    %cst_50 = arith.constant 0.000000e+00 : f32
    %58 = vector.broadcast %cst_50 : f32 to vector<320x8xf32>
    %59 = arith.maximumf %57, %58 : vector<320x8xf32>
    %c0_51 = arith.constant 0 : index
    %c0_52 = arith.constant 0 : index
    %c0_53 = arith.constant 0 : index
    %60 = vector.load %arg4[%c0_51, %c0_52, %c0_53] : memref<1x320x8xf32, #tpu.memory_space<vmem>>, vector<1x320x8xf32>
    %61 = vector.shape_cast %60 : vector<1x320x8xf32> to vector<320x8xf32>
    %62 = vector.shape_cast %59 : vector<320x8xf32> to vector<1x320x8xf32>
    tpu.vector_store %arg4[%c0_51, %c0_52, %c0_53], %62 {strides = array<i32>} : memref<1x320x8xf32, #tpu.memory_space<vmem>>, vector<1x320x8xf32>,
    return
  }
  func.func @transform_0(%arg0: i32) -> (i32, i32, i32) {
    %c0_i32 = arith.constant 0 : i32
    %c0_i32_0 = arith.constant 0 : i32
    %c0_i32_1 = arith.constant 0 : i32
    return %arg0, %c0_i32, %c0_i32_0 : i32, i32, i32
  }
  func.func @transform_1(%arg0: i32) -> (i32, i32, i32) {
    %c0_i32 = arith.constant 0 : i32
    %c0_i32_0 = arith.constant 0 : i32
    %c0_i32_1 = arith.constant 0 : i32
    %c0_i32_2 = arith.constant 0 : i32
    return %c0_i32, %c0_i32_0, %c0_i32_1 : i32, i32, i32
  }
  func.func @transform_2(%arg0: i32) -> (i32, i32) {
    %c0_i32 = arith.constant 0 : i32
    %c0_i32_0 = arith.constant 0 : i32
    %c0_i32_1 = arith.constant 0 : i32
    return %c0_i32, %c0_i32_0 : i32, i32
  }
  func.func @transform_3(%arg0: i32) -> (i32, i32, i32) {
    %c0_i32 = arith.constant 0 : i32
    %c0_i32_0 = arith.constant 0 : i32
    %c0_i32_1 = arith.constant 0 : i32
    return %arg0, %c0_i32, %c0_i32_0 : i32, i32, i32
  }
}

</mosaic_0001>

<bundles_post_ra>
// kernel: _lambda_.1
= control target key start
LH: loop header
LB: loop body
LE: loop exit
PB: predicated region body
PF: predicated region fallthrough
CT: control target
= control target key end

     0   :  { %s5200_s12 = smov 0   ;;  %s6656_s0 = inlined_call_operand.vmem [shape: bf16[2,368,4], index: 0, kind: input, shape index: {}]   ;;  %s6657_s1 = inlined_call_operand.vmem [shape: bf16[9,4,8], index: 1, kind: input, shape index: {}]   ;;  %s6658_s2 = inlined_call_operand.vmem [shape: f32[1,8], index: 2, kind: input, shape index: {}]   ;;  %s6659_s3 = inlined_call_operand.vmem [shape: f32[2,320,8], index: 3, kind: output, shape index: {}]  }
   0x1 LB: > { %s4211_s13 = sadd.s32 4294967295, %s5178_s12   ;;  %p4215_p0 = scmp.ge.s32.totalorder %s5178_s12, 1  ;;  %s5178_s12 = sphi %s5200_s12, %s13_s12  }
   0x2   : > { %p137_p1 = scmp.lt.s32.totalorder %s5178_s12, 3 }
   0x4   : > { %p138_p2 = pnand %p4215_p0, %p137_p1 }
   0x6   : > { %141 = sbr.rel (%p138_p2) target bundleno = 587 (0x24b), region = 32 }
   0xb   : > { %v4218_v0 = vld [vmem:[%s6657_s1 + $0x2] sm:$0x3]  ;;  %vm545_vm0 = vcmask 1041408   ;;  %p161_p3 = scmp.lt.s32.totalorder %s4211_s13, 1  ;;  %v212_v2 = vld [vmem:[%s6657_s1] sm:$0x3] }
   0xc   : > { %5066 = vmatprep.subr.msk.bf16.mxu1 %vm545_vm0, %v4218_v0  ;;  %5065 = vmatprep.subr.msk.bf16.mxu0 %vm545_vm0, %v4218_v0  ;;  %v547_v1 = vsel %vm545_vm0, %v4218_v0, 0  ;;  %v4280_v3 = vld [vmem:[%s6657_s1 + $0x4] sm:$0x3]  ;;  %vm319_vm1 = vsmask.f32 7424  ;;  %vm484_vm2 = vcmask 31744  }
   0xd   : > { %5064 = vmatpush3.bf16.msra.mxu1 %v547_v1  ;;  %4686 = vmatpush3.bf16.msra.mxu0 %v547_v1  ;;  %s6673_s13 = smov (!%p161_p3, %s4211_s13), 1  ;;  %v783_v8 = vsel %vm545_vm0, %v212_v2, 0  ;;  %v1087_v16 = vsel %vm545_vm0, %v4280_v3, 0  ;;  %v5273_v33 = vld [vmem:[%s6657_s1 + $0x8] sm:$0x3]  ;;  %vm984_vm3 = vcmask 1046528  }
   0xe   : > { %5067 = vmatprep.subr.msk.bf16.mxu1 %vm545_vm0, %v212_v2  ;;  %5068 = vmatprep.subr.msk.bf16.mxu0 %vm545_vm0, %v4280_v3  ;;  %s5075_s20 = smul.u32 184, %s6673_s13  ;;  %v5293_v45 = vld [vmem:[%s6657_s1 + $0x6] sm:$0x3]  ;;  %vm2303_vm4 = vcmask 1044480   ;;  %vm1812_vm5 = vsmask.f32 5376 }
   0xf   : > { %vm1468_vm6 = vcmask 1045504   ;;  %s5076_s9 = smul.u32 320, %s6673_s13  ;;  %vm4115_vm7 = vcmask 64512  }
  0x10   : > { %s5228_s23 = scalar_lea.vmem %s6656_s0, %s5075_s20 }
  0x11   : > { %v172_v4 = vld [vmem:[%s5228_s23] sm:$0xf]  ;;  %v5232_v5 = vld [vmem:[%s5228_s23 + $0x4] sm:$0xf]  ;;  %v5238_v7 = vld [vmem:[%s5228_s23 + $0x8] sm:$0xff]   ;;  %s6495_s13 = scalar_lea.vmem %s6659_s3, %s5076_s9 }
  0x12   : > { %v5235_v6 = vcombine.low %v172_v4, %v5232_v5  ;;  %v328_v11 = vshll.u32 %v5238_v7, 16  ;;  %v332_v12 = vshrl.u32 %v5238_v7, 16  ;;  %v5246_v13 = vld [vmem:[%s5228_s23 + $0x50] sm:$0xff]   ;;  %v5249_v14 = vld [vmem:[%s5228_s23 + $0x58] sm:$0xff]   ;;  %v5261_v24 = vld [vmem:[%s5228_s23 + $0x60] sm:$0xff]  }
  0x13   : > { %v5252_v15 = vld [vmem:[%s5228_s23 + $0x10] sm:$0xff]   ;;  %v400_v19 = vshll.u32 %v5246_v13, 16  ;;  %v404_v20 = vshrl.u32 %v5246_v13, 16  ;;  %v408_v21 = vshll.u32 %v5249_v14, 16  ;;  %v412_v22 = vshrl.u32 %v5249_v14, 16  ;;  %v5266_v28 = vld [vmem:[%s5228_s23 + $0x18] sm:$0xff]  }
  0x14   : > { %v321_v9 = vshrl.u32 %v5235_v6, 16  ;;  %v323_v10 = vshll.u32 %v5235_v6, 16  ;;  %v330_v18 = vrot.slane %v328_v11, 1  ;;  %v336_v23 = vshll.u32 %v5252_v15, 16  ;;  %v5279_v37 = vld [vmem:[%s5228_s23 + $0x68] sm:$0xff]   ;;  %v5283_v39 = vld [vmem:[%s5228_s23 + $0x20] sm:$0xff]  }
  0x15   : > { %v5263_v27 = vrot.slane %v400_v19, 1  ;;  %v410_v29 = vrot.slane %v408_v21, 1  ;;  %v416_v31 = vshll.u32 %v5261_v24, 16  ;;  %v340_v32 = vshrl.u32 %v5252_v15, 16  ;;  %v5288_v44 = vld [vmem:[%s5228_s23 + $0x70] sm:$0xff]   ;;  %v5300_v50 = vld [vmem:[%s5228_s23 + $0x28] sm:$0xff]  }
  0x16   : > { %v325_v17 = vrot.slane %v323_v10, 1  ;;  %v334_v26 = vor.u32 %v332_v12, %v330_v18  ;;  %v338_v30 = vrot.slane %v336_v23, 1  ;;  %v344_v36 = vshll.u32 %v5266_v28, 16  ;;  %v5315_v62 = vld [vmem:[%s5228_s23 + $0x78] sm:$0xff]   ;;  %v5325_v10 = vld [vmem:[%s5228_s23 + $0x30] sm:$0xff]   ;;  %v5328_v11 = vld [vmem:[%s5228_s23 + $0x80] sm:$0xff]  }
  0x17   : > { %v406_v35 = vor.u32 %v404_v20, %v5263_v27  ;;  %v420_v38 = vshrl.u32 %v5261_v24, 16  ;;  %v414_v40 = vor.u32 %v412_v22, %v410_v29  ;;  %v418_v42 = vrot.slane %v416_v31, 1  ;;  %v5337_v23 = vld [vmem:[%s5228_s23 + $0x38] sm:$0xff]  }
  0x18   : > { %v326_v25 = vor.u32 %v325_v17, %v321_v9  ;;  %v339_v41 = vsel %vm319_vm1, %v334_v26, %v338_v30  ;;  %v342_v43 = vor.u32 %v340_v32, %v338_v30  ;;  %v346_v47 = vrot.slane %v344_v36, 1  ;;  %v5342_v26 = vld [vmem:[%s5228_s23 + $0x88] sm:$0xff]  }
  0x19   : > { %v411_v46 = vsel %vm319_vm1, %v406_v35, %v410_v29  ;;  %v424_v48 = vshll.u32 %v5279_v37, 16  ;;  %v348_v49 = vshrl.u32 %v5266_v28, 16  ;;  %v419_v51 = vsel %vm319_vm1, %v414_v40, %v418_v42  ;;  %v5354_v40 = vld [vmem:[%s5228_s23 + $0x90] sm:$0xff]  }
  0x1a   : > { %v331_v34 = vsel %vm319_vm1, %v326_v25, %v330_v18  ;;  %4707 = vmatprep.mubr.msk.bf16.mxu1 %vm484_vm2, %v411_v46  ;;  %v422_v52 = vor.u32 %v420_v38, %v418_v42  ;;  %v352_v53 = vshll.u32 %v5283_v39, 16  ;;  %v428_v54 = vshrl.u32 %v5279_v37, 16  ;;  %v5351_v38 = vld [vmem:[%s5228_s23 + $0x40] sm:$0xff]  }
  0x1b   : > { %4687 = vmatprep.mubr.msk.bf16.mxu0 %vm484_vm2, %v331_v34  ;;  %4708 = vmatmul.mubr.msk.bf16.vlgmr.msra.gmra.mxu1 %vm484_vm2, %v419_v51  ;;  %v347_v55 = vsel %vm319_vm1, %v342_v43, %v346_v47  ;;  %v426_v56 = vrot.slane %v424_v48, 1  ;;  %v350_v57 = vor.u32 %v348_v49, %v346_v47  ;;  %v432_v58 = vshll.u32 %v5288_v44, 16  ;;  %v5358_v43 = vld [vmem:[%s5228_s23 + $0x48] sm:$0xff]   ;;  %v5362_v51 = vld [vmem:[%s5228_s23 + $0x98] sm:$0xff]  }
  0x1c   : > { %4688 = vmatmul.mubr.msk.bf16.vlgmr.msra.gmra.mxu0 %vm484_vm2, %v339_v41  ;;  %4728 = vmatpush3.bf16.msra.mxu1 %v783_v8  ;;  %v354_v59 = vrot.slane %v352_v53, 1  ;;  %v356_v60 = vshrl.u32 %v5283_v39, 16  ;;  %v360_v61 = vshll.u32 %v5300_v50, 16  ;;  %v436_v2 = vshrl.u32 %v5288_v44, 16 }
  0x1d   : > { %4770 = vmatpush3.bf16.msra.mxu0 %v1087_v16  ;;  %4691 = vmatprep.mubr.msk.bf16.mxu0 %vm484_vm2, %v347_v55  ;;  %v427_v63 = vsel %vm319_vm1, %v422_v52, %v426_v56  ;;  %v430_v0 = vor.u32 %v428_v54, %v426_v56  ;;  %v434_v1 = vrot.slane %v432_v58, 1  ;;  %v440_v9 = vshll.u32 %v5315_v62, 16 }
  0x1e   : > { %5070 = vmatprep.subr.msk.bf16.mxu0 %vm545_vm0, %v5273_v33  ;;  %5069 = vmatprep.subr.msk.bf16.mxu1 %vm545_vm0, %v5293_v45  ;;  %v355_v3 = vsel %vm319_vm1, %v350_v57, %v354_v59  ;;  %v358_v4 = vor.u32 %v356_v60, %v354_v59  ;;  %v362_v8 = vrot.slane %v360_v61, 1  ;;  %v364_v17 = vshrl.u32 %v5300_v50, 16 }
  0x1f   : > { %4711 = vmatprep.mubr.msk.bf16.mxu1 %vm484_vm2, %v427_v63  ;;  %v435_v12 = vsel %vm319_vm1, %v430_v0, %v434_v1  ;;  %v438_v16 = vor.u32 %v436_v2, %v434_v1  ;;  %v444_v18 = vshrl.u32 %v5315_v62, 16  ;;  %v442_v20 = vrot.slane %v440_v9, 1 }
  0x20   : > { %v363_v19 = vsel %vm319_vm1, %v358_v4, %v362_v8  ;;  %v368_v21 = vshll.u32 %v5325_v10, 16  ;;  %v448_v22 = vshll.u32 %v5328_v11, 16  ;;  %v372_v25 = vshrl.u32 %v5325_v10, 16 }
  0x21   : > { %v443_v29 = vsel %vm319_vm1, %v438_v16, %v442_v20  ;;  %v366_v30 = vor.u32 %v364_v17, %v362_v8  ;;  %v376_v34 = vshll.u32 %v5337_v23, 16  ;;  %v452_v35 = vshrl.u32 %v5328_v11, 16  ;;  %v5379_v8 = vld [vmem:[%s5228_s23 + $0xa0] ss:$0 sps:$4 sm:$0x11]  }
  0x22   : > { %v370_v31 = vrot.slane %v368_v21, 1  ;;  %v450_v32 = vrot.slane %v448_v22, 1  ;;  %v456_v36 = vshll.u32 %v5342_v26, 16  ;;  %v446_v41 = vor.u32 %v444_v18, %v442_v20 }
  0x23   : > { %4712 = vmatmul.mubr.msk.bf16.gmra.mxu1 %vm484_vm2, %v435_v12  ;;  %v378_v46 = vrot.slane %v376_v34, 1  ;;  %v384_v49 = vshll.u32 %v5351_v38, 16  ;;  %v380_v53 = vshrl.u32 %v5337_v23, 16  ;;  %v464_v54 = vshll.u32 %v5354_v40, 16  ;;  %v978_v12 = vld [vmem:[%s5228_s23] sm:$0xe] }
  0x24   : > { %4692 = vmatmul.mubr.msk.bf16.gmra.mxu0 %vm484_vm2, %v355_v3  ;;  %4715 = vmatprep.mubr.msk.bf16.mxu1 %vm484_vm2, %v443_v29  ;;  %v374_v42 = vor.u32 %v372_v25, %v370_v31  ;;  %v454_v47 = vor.u32 %v452_v35, %v450_v32  ;;  %v458_v48 = vrot.slane %v456_v36, 1  ;;  %v371_v52 = vsel %vm319_vm1, %v366_v30, %v370_v31 }
  0x25   : > { %4695 = vmatprep.mubr.msk.bf16.mxu0 %vm484_vm2, %v363_v19  ;;  %v388_v56 = vshrl.u32 %v5351_v38, 16  ;;  %v392_v57 = vshll.u32 %v5358_v43, 16  ;;  %v451_v58 = vsel %vm319_vm1, %v446_v41, %v450_v32  ;;  %v460_v59 = vshrl.u32 %v5342_v26, 16 }
  0x26   : > { %v379_v55 = vsel %vm319_vm1, %v374_v42, %v378_v46  ;;  %v459_v60 = vsel %vm319_vm1, %v454_v47, %v458_v48  ;;  %v386_v61 = vrot.slane %v384_v49, 1  ;;  %v468_v63 = vshrl.u32 %v5354_v40, 16 }
  0x27   : > { %v472_v0 = vshll.u32 %v5362_v51, 16  ;;  %v382_v1 = vor.u32 %v380_v53, %v378_v46  ;;  %v466_v2 = vrot.slane %v464_v54, 1  ;;  %v394_v4 = vrot.slane %v392_v57, 1 }
  0x28   : > { %v390_v3 = vor.u32 %v388_v56, %v386_v61  ;;  %v462_v9 = vor.u32 %v460_v59, %v458_v48  ;;  %v396_v19 = vshrl.u32 %v5358_v43, 16  ;;  %v4281_v21 = vcombine.low %v978_v12, %v5232_v5 }
  0x29   : > { %v470_v16 = vor.u32 %v468_v63, %v466_v2  ;;  %v474_v17 = vrot.slane %v472_v0, 1  ;;  %v387_v18 = vsel %vm319_vm1, %v382_v1, %v386_v61  ;;  %v476_v25 = vshrl.u32 %v5362_v51, 16  ;;  %v5466_v61 = vld [vmem:[%s5228_s23 + $0x10] sm:$0xff]   ;;  %v5471_v0 = vld [vmem:[%s5228_s23 + $0x18] sm:$0xff]  }
  0x2a   : > { %v395_v20 = vsel %vm319_vm1, %v390_v3, %v394_v4  ;;  %v467_v22 = vsel %vm319_vm1, %v462_v9, %v466_v2  ;;  %v480_v29 = vshll.u32 %v5379_v8, 16  ;;  %v398_v31 = vor.u32 %v396_v19, %v394_v4  ;;  %v1323_v2 = vld [vmem:[%s5228_s23 + $0xc] sm:$0xf] }
  0x2b   : > { %4716 = vmatmul.mubr.msk.bf16.gmra.mxu1 %vm484_vm2, %v451_v58  ;;  %v475_v30 = vsel %vm319_vm1, %v470_v16, %v474_v17  ;;  %v985_v32 = vrot.slane %v4281_v21, 1  ;;  %v986_v34 = vrot.slane %v5238_v7, 1  ;;  %v478_v5 = vor.u32 %v476_v25, %v474_v17  ;;  %v5489_v17 = vld [vmem:[%s5228_s23 + $0x20] sm:$0xff]   ;;  %v5495_v19 = vld [vmem:[%s5228_s23 + $0x28] sm:$0xff]  }
  0x2c   : > { %4696 = vmatmul.mubr.msk.bf16.gmra.mxu0 %vm484_vm2, %v371_v52  ;;  %4719 = vmatprep.mubr.msk.bf16.mxu1 %vm484_vm2, %v459_v60  ;;  %v482_v35 = vrot.slane %v480_v29, 1  ;;  %v403_v36 = vsel %vm319_vm1, %v398_v31, %v5263_v27  ;;  %v988_v46 = vrot.slane %v5252_v15, 1  ;;  %v990_v47 = vrot.slane %v5266_v28, 1  ;;  %v5414_v52 = vld [vmem:[%s6657_s1 + $0xc] sm:$0x3]  ;;  %v5514_v31 = vld [vmem:[%s5228_s23 + $0x30] sm:$0xff]  }
  0x2d   : > { %4699 = vmatprep.mubr.msk.bf16.mxu0 %vm484_vm2, %v379_v55  ;;  %v987_v41 = vsel %vm984_vm3, %v985_v32, %v986_v34  ;;  %v2062_v27 = vsel %vm545_vm0, %v5273_v33, 0  ;;  %v1571_v53 = vsel %vm545_vm0, %v5293_v45, 0  ;;  %v5424_v33 = vld [vmem:[%s6657_s1 + $0xa] sm:$0x3]  ;;  %v994_v54 = vrot.slane %v5300_v50, 1  ;;  %v5519_v32 = vld [vmem:[%s5228_s23 + $0x38] sm:$0xff]  }
  0x2e   : > { %v483_v42 = vsel %vm319_vm1, %v478_v5, %v482_v35  ;;  %v989_v48 = vsel %vm984_vm3, %v986_v34, %v988_v46  ;;  %v991_v49 = vsel %vm984_vm3, %v988_v46, %v990_v47  ;;  %v998_v56 = vrot.slane %v5337_v23, 1 }
  0x2f   : > { %v1000_v58 = vrot.slane %v5351_v38, 1  ;;  %v1004_v60 = vrot.slane %v5246_v13, 1  ;;  %v1008_v4 = vrot.slane %v5261_v24, 1  ;;  %v1010_v12 = vrot.slane %v5279_v37, 1 }
  0x30   : > { %v2309_v21 = vrot.slane %v5489_v17, 3  ;;  %v1012_v25 = vrot.slane %v5288_v44, 1  ;;  %v1014_v29 = vrot.slane %v5315_v62, 1  ;;  %v2313_v35 = vrot.slane %v5514_v31, 3 }
  0x32   : > { %v1013_v34 = vsel %vm984_vm3, %v1010_v12, %v1012_v25  ;;  %v1015_v5 = vsel %vm984_vm3, %v1012_v25, %v1014_v29 }
  0x33   : > { %4720 = vmatmul.mubr.msk.bf16.gmra.mxu1 %vm484_vm2, %v467_v22  ;;  %v2311_v22 = vrot.slane %v5495_v19, 3 }
  0x34   : > { %4700 = vmatmul.mubr.msk.bf16.gmra.mxu0 %vm484_vm2, %v387_v18  ;;  %4723 = vmatprep.mubr.msk.bf16.mxu1 %vm484_vm2, %v475_v30 }
  0x35   : > { %4703 = vmatprep.mubr.msk.bf16.mxu0 %vm484_vm2, %v395_v20  ;;  %v5509_v30 = vsel %vm2303_vm4, %v2309_v21, %v2311_v22 }
  0x3b   : > { %4724 = vmatmul.mubr.msk.bf16.gmra.mxu1 %vm484_vm2, %v483_v42  ;;  %v1322_v42 = vld [vmem:[%s5228_s23 + $0x8] sm:$0xc] }
  0x3c   : > { %4704 = vmatmul.mubr.msk.bf16.gmra.mxu0 %vm484_vm2, %v403_v36  ;;  %4729 = vmatprep.mubr.msk.bf16.mxu1 %vm484_vm2, %v5235_v6  ;;  %v992_v6 = vrot.slane %v5283_v39, 1  ;;  %v2315_v36 = vrot.slane %v5519_v32, 3 }
  0x3d   : > { %4771 = vmatprep.mubr.msk.bf16.mxu0 %vm484_vm2, %v987_v41  ;;  %v1018_v41 = vrot.slane %v5342_v26, 1 }
  0x3e   : > { %v993_v45 = vsel %vm984_vm3, %v990_v47, %v992_v6  ;;  %v995_v55 = vsel %vm984_vm3, %v992_v6, %v994_v54  ;;  %v5534_v46 = vsel %vm2303_vm4, %v2313_v35, %v2315_v36  ;;  %v5541_v47 = vld [vmem:[%s5228_s23 + $0x40] sm:$0xff]  }
  0x3f   : > { %v2317_v6 = vrot.slane %v5541_v47, 3 }
  0x43   : > { %4730 = vmatmul.mubr.msk.bf16.vlgmr.msra.gmra.mxu1 %vm484_vm2, %v5238_v7  ;;  %v996_v7 = vrot.slane %v5325_v10, 1 }
  0x44   : > { %4772 = vmatmul.mubr.msk.bf16.vlgmr.msra.gmra.mxu0 %vm484_vm2, %v989_v48  ;;  %4812 = vmatpush3.bf16.msra.mxu1 %v1571_v53  ;;  %v4303_v53 = vcombine.low %v1322_v42, %v1323_v2  ;;  %v1849_v42 = vshrl.u32 %v5495_v19, 16 }
  0x45   : > { %4854 = vmatpush3.bf16.msra.mxu0 %v2062_v27  ;;  %4775 = vmatprep.mubr.msk.bf16.mxu0 %vm484_vm2, %v991_v49  ;;  %v999_v57 = vsel %vm984_vm3, %v996_v7, %v998_v56  ;;  %v5545_v27 = vld [vmem:[%s5228_s23 + $0x48] sm:$0xff]  }
  0x46   : > { %5072 = vmatprep.subr.msk.bf16.mxu0 %vm545_vm0, %v5414_v52  ;;  %4733 = vmatprep.mubr.msk.bf16.mxu1 %vm484_vm2, %v5252_v15  ;;  %v997_v15 = vsel %vm984_vm3, %v994_v54, %v996_v7  ;;  %v2319_v54 = vrot.slane %v5545_v27, 3 }
  0x47   : > { %5071 = vmatprep.subr.msk.bf16.mxu1 %vm545_vm0, %v5424_v33 }
  0x48   : > { %v5559_v7 = vsel %vm2303_vm4, %v2317_v6, %v2319_v54 }
  0x4b   : > { %4734 = vmatmul.mubr.msk.bf16.gmra.mxu1 %vm484_vm2, %v5266_v28  ;;  %v1002_v28 = vrot.slane %v5358_v43, 1 }
  0x4c   : > { %4776 = vmatmul.mubr.msk.bf16.gmra.mxu0 %vm484_vm2, %v993_v45  ;;  %4737 = vmatprep.mubr.msk.bf16.mxu1 %vm484_vm2, %v5283_v39  ;;  %v1001_v39 = vsel %vm984_vm3, %v998_v56, %v1000_v58  ;;  %v1022_v45 = vrot.slane %v5362_v51, 1  ;;  %v1814_v56 = vshrl.u32 %v4303_v53, 16 }
  0x4d   : > { %4779 = vmatprep.mubr.msk.bf16.mxu0 %vm484_vm2, %v995_v55  ;;  %v1003_v59 = vsel %vm984_vm3, %v1000_v58, %v1002_v28  ;;  %v1005_v63 = vsel %vm984_vm3, %v1002_v28, %v1004_v60  ;;  %v1822_v55 = vshrl.u32 %v5466_v61, 16  ;;  %v5567_v58 = vld [vmem:[%s5228_s23 + $0x50] sm:$0xff]  }
  0x53   : > { %4738 = vmatmul.mubr.msk.bf16.gmra.mxu1 %vm484_vm2, %v5300_v50  ;;  %v1006_v50 = vrot.slane %v5249_v14, 1 }
  0x54   : > { %4780 = vmatmul.mubr.msk.bf16.gmra.mxu0 %vm484_vm2, %v997_v15  ;;  %4741 = vmatprep.mubr.msk.bf16.mxu1 %vm484_vm2, %v5325_v10  ;;  %v2297_v10 = vld [vmem:[%s5228_s23 + $0x8] sm:$0x8]  ;;  %v1817_v15 = vshll.u32 %v4303_v53, 16 }
  0x55   : > { %4783 = vmatprep.mubr.msk.bf16.mxu0 %vm484_vm2, %v999_v57  ;;  %v1007_v1 = vsel %vm984_vm3, %v1004_v60, %v1006_v50  ;;  %v4367_v3 = vcombine.low %v2297_v10, %v1323_v2  ;;  %v1009_v20 = vsel %vm984_vm3, %v1006_v50, %v1008_v4  ;;  %v1825_v57 = vshll.u32 %v5466_v61, 16  ;;  %v5572_v60 = vld [vmem:[%s5228_s23 + $0x58] sm:$0xff]  }
  0x56   : > { %v1816_v50 = vrot.slane %v1814_v56, 2  ;;  %v1819_v10 = vrot.slane %v1817_v15, 3  ;;  %v1024_v2 = vrot.slane %v5379_v8, 1  ;;  %v1469_v8 = vrot.slane %v4303_v53, 2 }
  0x57   : > { %v2304_v9 = vrot.slane %v4367_v3, 3  ;;  %v1831_v3 = vshrl.u32 %v5471_v0, 16  ;;  %v2844_v15 = vsel %vm545_vm0, %v5414_v52, 0  ;;  %v2406_v52 = vsel %vm545_vm0, %v5424_v33, 0 }
  0x59   : > { %v1833_v25 = vrot.slane %v1831_v3, 2  ;;  %v1867_v3 = vshrl.u32 %v5519_v32, 16 }
  0x5b   : > { %4742 = vmatmul.mubr.msk.bf16.gmra.mxu1 %vm484_vm2, %v5337_v23  ;;  %v2305_v23 = vrot.slane %v5466_v61, 3 }
  0x5c   : > { %4784 = vmatmul.mubr.msk.bf16.gmra.mxu0 %vm484_vm2, %v1001_v39  ;;  %4745 = vmatprep.mubr.msk.bf16.mxu1 %vm484_vm2, %v5351_v38  ;;  %v2307_v38 = vrot.slane %v5471_v0, 3 }
  0x5d   : > { %4787 = vmatprep.mubr.msk.bf16.mxu0 %vm484_vm2, %v1003_v59  ;;  %v5492_v18 = vsel %vm2303_vm4, %v2304_v9, %v2305_v23  ;;  %v1824_v59 = vrot.slane %v1822_v55, 2  ;;  %v5623_v55 = vld [vmem:[%s5228_s23 + $0x70] sm:$0xff]  }
  0x5e   : > { %v5484_v16 = vsel %vm2303_vm4, %v2305_v23, %v2307_v38  ;;  %v1834_v23 = vshll.u32 %v5471_v0, 16 }
  0x63   : > { %4746 = vmatmul.mubr.msk.bf16.gmra.mxu1 %vm484_vm2, %v5358_v43  ;;  %v1011_v43 = vsel %vm984_vm3, %v1008_v4, %v1010_v12  ;;  %v1820_v4 = vor.u32 %v1819_v10, %v1816_v50  ;;  %v1840_v12 = vshrl.u32 %v5489_v17, 16  ;;  %v2329_v10 = vrot.slane %v5623_v55, 3 }
  0x64   : > { %4788 = vmatmul.mubr.msk.bf16.gmra.mxu0 %vm484_vm2, %v1005_v63  ;;  %4749 = vmatprep.mubr.msk.bf16.mxu1 %vm484_vm2, %v5246_v13  ;;  %v5503_v13 = vsel %vm2303_vm4, %v2307_v38, %v2309_v21  ;;  %v1827_v63 = vrot.slane %v1825_v57, 3  ;;  %v5595_v21 = vld [vmem:[%s5228_s23 + $0x60] sm:$0xff]   ;;  %v1851_v57 = vrot.slane %v1849_v42, 2  ;;  %v1894_v42 = vshrl.u32 %v5567_v58, 16 }
  0x65   : > { %4791 = vmatprep.mubr.msk.bf16.mxu0 %vm484_vm2, %v1007_v1  ;;  %v2323_v1 = vrot.slane %v5572_v60, 3 }
  0x66   : > { %v1828_v9 = vor.u32 %v1827_v63, %v1824_v59 }
  0x6b   : > { %4750 = vmatmul.mubr.msk.bf16.gmra.mxu1 %vm484_vm2, %v5249_v14  ;;  %v5527_v14 = vsel %vm2303_vm4, %v2311_v22, %v2313_v35  ;;  %v1025_v22 = vsel %vm984_vm3, %v1022_v45, %v1024_v2 }
  0x6c   : > { %4792 = vmatmul.mubr.msk.bf16.gmra.mxu0 %vm484_vm2, %v1009_v20  ;;  %4753 = vmatprep.mubr.msk.bf16.mxu1 %vm484_vm2, %v5261_v24  ;;  %v1016_v24 = vrot.slane %v5328_v11, 1  ;;  %v1843_v20 = vshll.u32 %v5489_v17, 16 }
  0x6d   : > { %4795 = vmatprep.mubr.msk.bf16.mxu0 %vm484_vm2, %v1011_v43  ;;  %v1470_v43 = vrot.slane %v5466_v61, 2 }
  0x6e   : > { %v1017_v48 = vsel %vm984_vm3, %v1014_v29, %v1016_v24  ;;  %v1019_v49 = vsel %vm984_vm3, %v1016_v24, %v1018_v41  ;;  %v5599_v29 = vld [vmem:[%s5228_s23 + $0x68] sm:$0xff]   ;;  %v1845_v35 = vrot.slane %v1843_v20, 3  ;;  %v1879_v20 = vshll.u32 %v5541_v47, 16 }
  0x6f   : > { %v1471_v61 = vsel %vm1468_vm6, %v1469_v8, %v1470_v43  ;;  %v1476_v8 = vrot.slane %v5495_v19, 2 }
  0x73   : > { %4754 = vmatmul.mubr.msk.bf16.gmra.mxu1 %vm484_vm2, %v5279_v37  ;;  %v5552_v37 = vsel %vm2303_vm4, %v2315_v36, %v2317_v6  ;;  %v2325_v36 = vrot.slane %v5595_v21, 3  ;;  %v1858_v6 = vshrl.u32 %v5514_v31, 16 }
  0x74   : > { %4796 = vmatmul.mubr.msk.bf16.gmra.mxu0 %vm484_vm2, %v1013_v34  ;;  %4757 = vmatprep.mubr.msk.bf16.mxu1 %vm484_vm2, %v5288_v44  ;;  %v1020_v44 = vrot.slane %v5354_v40, 1  ;;  %v1829_v34 = vsel %vm1812_vm5, %v1820_v4, %v1828_v9  ;;  %v5653_v4 = vld [vmem:[%s6657_s1 + $0xe] sm:$0x3] }
  0x75   : > { %4799 = vmatprep.mubr.msk.bf16.mxu0 %vm484_vm2, %v1015_v5  ;;  %v1842_v5 = vrot.slane %v1840_v12, 2  ;;  %v5607_v24 = vsel %vm2303_vm4, %v2323_v1, %v2325_v36  ;;  %v1860_v59 = vrot.slane %v1858_v6, 2  ;;  %v1876_v12 = vshrl.u32 %v5541_v47, 16 }
  0x76   : > { %v1021_v28 = vsel %vm984_vm3, %v1018_v41, %v1020_v44  ;;  %v1023_v39 = vsel %vm984_vm3, %v1020_v44, %v1022_v45  ;;  %v1472_v44 = vrot.slane %v5471_v0, 2  ;;  %v1474_v45 = vrot.slane %v5489_v17, 2  ;;  %v5637_v17 = vld [vmem:[%s6657_s1 + $0x10] sm:$0x3] }
  0x77   : > { %v1846_v53 = vor.u32 %v1845_v35, %v1842_v5  ;;  %v1878_v5 = vrot.slane %v1876_v12, 2  ;;  %v1881_v35 = vrot.slane %v1879_v20, 3  ;;  %v1482_v6 = vrot.slane %v5541_v47, 2 }
  0x78   : > { %v1473_v0 = vsel %vm1468_vm6, %v1470_v43, %v1472_v44  ;;  %v1478_v43 = vrot.slane %v5514_v31, 2  ;;  %v1906_v47 = vshll.u32 %v5572_v60, 16 }
  0x7b   : > { %4758 = vmatmul.mubr.msk.bf16.gmra.mxu1 %vm484_vm2, %v5315_v62  ;;  %v2321_v62 = vrot.slane %v5567_v58, 3 }
  0x7c   : > { %4800 = vmatmul.mubr.msk.bf16.gmra.mxu0 %vm484_vm2, %v1017_v48  ;;  %4761 = vmatprep.mubr.msk.bf16.mxu1 %vm484_vm2, %v5328_v11  ;;  %v1852_v48 = vshll.u32 %v5495_v19, 16 }
  0x7d   : > { %4803 = vmatprep.mubr.msk.bf16.mxu0 %vm484_vm2, %v1019_v49  ;;  %v5578_v11 = vsel %vm2303_vm4, %v2319_v54, %v2321_v62  ;;  %v5585_v38 = vsel %vm2303_vm4, %v2321_v62, %v2323_v1  ;;  %v1861_v54 = vshll.u32 %v5514_v31, 16  ;;  %v1475_v62 = vsel %vm1468_vm6, %v1472_v44, %v1474_v45 }
  0x7e   : > { %v1885_v31 = vshrl.u32 %v5545_v27, 16 }
  0x7f   : > { %v1863_v50 = vrot.slane %v1861_v54, 3 }
  0x80   : > { %v1887_v44 = vrot.slane %v1885_v31, 2 }
  0x83   : > { %4762 = vmatmul.mubr.msk.bf16.gmra.mxu1 %vm484_vm2, %v5342_v26  ;;  %v1836_v26 = vrot.slane %v1834_v23, 3  ;;  %v1870_v23 = vshll.u32 %v5519_v32, 16 }
  0x84   : > { %4804 = vmatmul.mubr.msk.bf16.gmra.mxu0 %vm484_vm2, %v1021_v28  ;;  %4765 = vmatprep.mubr.msk.bf16.mxu1 %vm484_vm2, %v5354_v40  ;;  %v2327_v40 = vrot.slane %v5599_v29, 3  ;;  %v5629_v28 = vld [vmem:[%s5228_s23 + $0x78] sm:$0xff]  }
  0x85   : > { %4807 = vmatprep.mubr.msk.bf16.mxu0 %vm484_vm2, %v1023_v39  ;;  %v1837_v41 = vor.u32 %v1836_v26, %v1833_v25  ;;  %v6660_v63 = vrot.slane %v5629_v28, 3  ;;  %v1869_v25 = vrot.slane %v1867_v3, 2  ;;  %v1872_v26 = vrot.slane %v1870_v23, 3 }
  0x86   : > { %v5613_v49 = vsel %vm2303_vm4, %v2325_v36, %v2327_v40  ;;  %v5645_v1 = vsel %vm2303_vm4, %v2327_v40, %v2329_v10  ;;  %v1477_v36 = vsel %vm1468_vm6, %v1474_v45, %v1476_v8  ;;  %v1479_v40 = vsel %vm1468_vm6, %v1476_v8, %v1478_v43 }
  0x87   : > { %v1838_v56 = vsel %vm1812_vm5, %v1828_v9, %v1837_v41  ;;  %v1847_v39 = vsel %vm1812_vm5, %v1837_v41, %v1846_v53  ;;  %v5658_v33 = vsel %vm2303_vm4, %v2329_v10, %v6660_v63  ;;  %v1864_v9 = vor.u32 %v1863_v50, %v1860_v59 }
  0x88   : > { %v1873_v19 = vor.u32 %v1872_v26, %v1869_v25  ;;  %v1882_v41 = vor.u32 %v1881_v35, %v1878_v5  ;;  %v1912_v10 = vshrl.u32 %v5595_v21, 16  ;;  %v1908_v23 = vrot.slane %v1906_v47, 3 }
  0x89   : > { %v1930_v26 = vshrl.u32 %v5623_v55, 16  ;;  %v1488_v5 = vrot.slane %v5572_v60, 2  ;;  %v1490_v35 = vrot.slane %v5595_v21, 2 }
  0x8a   : > { %v1874_v54 = vsel %vm1812_vm5, %v1864_v9, %v1873_v19  ;;  %v1914_v12 = vrot.slane %v1912_v10, 2  ;;  %v5735_v10 = vld [vmem:[%s5228_s23 + $0x90] sm:$0xff]  }
  0x8b   : > { %4766 = vmatmul.mubr.msk.bf16.gmra.mxu1 %vm484_vm2, %v5362_v51  ;;  %v1854_v51 = vrot.slane %v1852_v48, 3  ;;  %v1897_v48 = vshll.u32 %v5567_v58, 16 }
  0x8c   : > { %4808 = vmatmul.mubr.msk.bf16.gmra.mxu0 %vm484_vm2, %v1025_v22  ;;  %4813 = vmatprep.mubr.msk.bf16.mxu1 %vm484_vm2, %v1471_v61  ;;  %v1888_v61 = vshll.u32 %v5545_v27, 16 }
  0x8d   : > { %4855 = vmatprep.mubr.msk.bf16.mxu0 %vm484_vm2, %v1829_v34  ;;  %v1855_v2 = vor.u32 %v1854_v51, %v1851_v57  ;;  %v1899_v57 = vrot.slane %v1897_v48, 3 }
  0x8e   : > { %v1890_v45 = vrot.slane %v1888_v61, 3  ;;  %v1932_v61 = vrot.slane %v1930_v26, 2  ;;  %v5755_v26 = vld [vmem:[%s5228_s23 + $0xa0] sm:$0xff]  }
  0x8f   : > { %v1856_v22 = vsel %vm1812_vm5, %v1846_v53, %v1855_v2  ;;  %v1865_v34 = vsel %vm1812_vm5, %v1855_v2, %v1864_v9  ;;  %v1480_v53 = vrot.slane %v5519_v32, 2  ;;  %v1903_v32 = vshrl.u32 %v5572_v60, 16 }
  0x90   : > { %v1891_v59 = vor.u32 %v1890_v45, %v1887_v44 }
  0x91   : > { %v1481_v51 = vsel %vm1468_vm6, %v1478_v43, %v1480_v53  ;;  %v1905_v3 = vrot.slane %v1903_v32, 2 }
  0x92   : > { %v1892_v2 = vsel %vm1812_vm5, %v1882_v41, %v1891_v59 }
  0x93   : > { %4814 = vmatmul.mubr.msk.bf16.vlgmr.msra.gmra.mxu1 %vm484_vm2, %v1473_v0  ;;  %v1915_v0 = vshll.u32 %v5595_v21, 16  ;;  %v1939_v21 = vshrl.u32 %v5629_v28, 16 }
  0x94   : > { %4856 = vmatmul.mubr.msk.bf16.vlgmr.msra.gmra.mxu0 %vm484_vm2, %v1838_v56  ;;  %4896 = vmatpush3.bf16.msra.mxu1 %v2406_v52  ;;  %v1883_v56 = vsel %vm1812_vm5, %v1873_v19, %v1882_v41  ;;  %v1484_v52 = vrot.slane %v5545_v27, 2  ;;  %v1921_v27 = vshrl.u32 %v5599_v29, 16 }
  0x95   : > { %4938 = vmatpush3.bf16.msra.mxu0 %v2844_v15  ;;  %4859 = vmatprep.mubr.msk.bf16.mxu0 %vm484_vm2, %v1847_v39  ;;  %v1896_v15 = vrot.slane %v1894_v42, 2  ;;  %v1483_v39 = vsel %vm1468_vm6, %v1480_v53, %v1482_v6  ;;  %v1917_v20 = vrot.slane %v1915_v0, 3  ;;  %v5715_v42 = vld [vmem:[%s5228_s23 + $0x80] sm:$0xff]   ;;  %v1491_v53 = vsel %vm1468_vm6, %v1488_v5, %v1490_v35 }
  0x96   : > { %5074 = vmatprep.subr.msk.bf16.mxu0 %vm545_vm0, %v5637_v17  ;;  %4817 = vmatprep.mubr.msk.bf16.mxu1 %vm484_vm2, %v1475_v62  ;;  %v1486_v62 = vrot.slane %v5567_v58, 2  ;;  %v1485_v8 = vsel %vm1468_vm6, %v1482_v6, %v1484_v52  ;;  %v1924_v58 = vshll.u32 %v5599_v29, 16  ;;  %v1942_v6 = vshll.u32 %v5629_v28, 16 }
  0x97   : > { %5073 = vmatprep.subr.msk.bf16.mxu1 %vm545_vm0, %v5653_v4  ;;  %v1900_v50 = vor.u32 %v1899_v57, %v1896_v15  ;;  %v1918_v25 = vor.u32 %v1917_v20, %v1914_v12  ;;  %v1948_v44 = vshrl.u32 %v5715_v42, 16  ;;  %v1951_v45 = vshll.u32 %v5715_v42, 16 }
  0x98   : > { %v1487_v43 = vsel %vm1468_vm6, %v1484_v52, %v1486_v62  ;;  %v1926_v19 = vrot.slane %v1924_v58, 3  ;;  %v1489_v48 = vsel %vm1468_vm6, %v1486_v62, %v1488_v5  ;;  %v1494_v15 = vrot.slane %v5623_v55, 2 }
  0x99   : > { %v1901_v9 = vsel %vm1812_vm5, %v1891_v59, %v1900_v50  ;;  %v5731_v59 = vld [vmem:[%s5228_s23 + $0x88] sm:$0xff]   ;;  %v1950_v47 = vrot.slane %v1948_v44, 2  ;;  %v1498_v12 = vrot.slane %v5715_v42, 2 }
  0x9a   : > { %v1957_v52 = vshrl.u32 %v5731_v59, 16  ;;  %v1960_v62 = vshll.u32 %v5731_v59, 16 }
  0x9b   : > { %4818 = vmatmul.mubr.msk.bf16.gmra.mxu1 %vm484_vm2, %v1477_v36 }
  0x9c   : > { %4860 = vmatmul.mubr.msk.bf16.gmra.mxu0 %vm484_vm2, %v1856_v22  ;;  %4821 = vmatprep.mubr.msk.bf16.mxu1 %vm484_vm2, %v1479_v40  ;;  %v1909_v22 = vor.u32 %v1908_v23, %v1905_v3  ;;  %v1923_v40 = vrot.slane %v1921_v27, 2  ;;  %v1966_v3 = vshrl.u32 %v5735_v10, 16  ;;  %v1969_v23 = vshll.u32 %v5735_v10, 16 }
  0x9d   : > { %4863 = vmatprep.mubr.msk.bf16.mxu0 %vm484_vm2, %v1865_v34  ;;  %v1933_v34 = vshll.u32 %v5623_v55, 16 }
  0x9e   : > { %v1910_v36 = vsel %vm1812_vm5, %v1900_v50, %v1909_v22  ;;  %v1919_v31 = vsel %vm1812_vm5, %v1909_v22, %v1918_v25  ;;  %v1927_v60 = vor.u32 %v1926_v19, %v1923_v40  ;;  %v1953_v50 = vrot.slane %v1951_v45, 3  ;;  %v5751_v22 = vld [vmem:[%s5228_s23 + $0x98] sm:$0xff]  }
  0x9f   : > { %v1935_v41 = vrot.slane %v1933_v34, 3  ;;  %v1968_v58 = vrot.slane %v1966_v3, 2  ;;  %v1978_v40 = vshll.u32 %v5751_v22, 16 }
  0xa0   : > { %v1928_v57 = vsel %vm1812_vm5, %v1918_v25, %v1927_v60  ;;  %v1971_v25 = vrot.slane %v1969_v23, 3 }
  0xa2   : > { %v1972_v19 = vor.u32 %v1971_v25, %v1968_v58 }
  0xa3   : > { %4822 = vmatmul.mubr.msk.bf16.gmra.mxu1 %vm484_vm2, %v1481_v51  ;;  %v1941_v51 = vrot.slane %v1939_v21, 2  ;;  %v1980_v21 = vrot.slane %v1978_v40, 3 }
  0xa4   : > { %4864 = vmatmul.mubr.msk.bf16.gmra.mxu0 %vm484_vm2, %v1874_v54  ;;  %4825 = vmatprep.mubr.msk.bf16.mxu1 %vm484_vm2, %v1483_v39  ;;  %v1936_v54 = vor.u32 %v1935_v41, %v1932_v61  ;;  %v1944_v39 = vrot.slane %v1942_v6, 3  ;;  %v1987_v61 = vshll.u32 %v5755_v26, 16  ;;  %v1500_v41 = vrot.slane %v5731_v59, 2  ;;  %v5771_v6 = vld [vmem:[%s5228_s23 + $0xa8] ss:$0 sps:$4 sm:$0x77]  }
  0xa5   : > { %4867 = vmatprep.mubr.msk.bf16.mxu0 %vm484_vm2, %v1883_v56  ;;  %v1492_v56 = vrot.slane %v5599_v29, 2 }
  0xa6   : > { %v1937_v32 = vsel %vm1812_vm5, %v1927_v60, %v1936_v54  ;;  %v1945_v55 = vor.u32 %v1944_v39, %v1941_v51  ;;  %v1989_v45 = vrot.slane %v1987_v61, 3  ;;  %v1993_v51 = vshrl.u32 %v5771_v6, 16 }
  0xa7   : > { %v1493_v0 = vsel %vm1468_vm6, %v1490_v35, %v1492_v56  ;;  %v1495_v29 = vsel %vm1468_vm6, %v1492_v56, %v1494_v15  ;;  %v1501_v56 = vsel %vm1468_vm6, %v1498_v12, %v1500_v41  ;;  %v1996_v39 = vshll.u32 %v5771_v6, 16 }
  0xa8   : > { %v1946_v20 = vsel %vm1812_vm5, %v1936_v54, %v1945_v55 }
  0xab   : > { %4826 = vmatmul.mubr.msk.bf16.gmra.mxu1 %vm484_vm2, %v1485_v8  ;;  %v1959_v8 = vrot.slane %v1957_v52, 2 }
  0xac   : > { %4868 = vmatmul.mubr.msk.bf16.gmra.mxu0 %vm484_vm2, %v1892_v2  ;;  %4829 = vmatprep.mubr.msk.bf16.mxu1 %vm484_vm2, %v1487_v43  ;;  %v1954_v2 = vor.u32 %v1953_v50, %v1950_v47  ;;  %v1962_v43 = vrot.slane %v1960_v62, 3  ;;  %v1504_v47 = vrot.slane %v5751_v22, 2  ;;  %v1506_v50 = vrot.slane %v5755_v26, 2 }
  0xad   : > { %4871 = vmatprep.mubr.msk.bf16.mxu0 %vm484_vm2, %v1901_v9  ;;  %v1496_v9 = vrot.slane %v5629_v28, 2 }
  0xae   : > { %v1955_v27 = vsel %vm1812_vm5, %v1945_v55, %v1954_v2  ;;  %v1963_v35 = vor.u32 %v1962_v43, %v1959_v8  ;;  %v1998_v55 = vrot.slane %v1996_v39, 3  ;;  %v1507_v3 = vsel %vm1468_vm6, %v1504_v47, %v1506_v50 }
  0xaf   : > { %v1497_v34 = vsel %vm1468_vm6, %v1494_v15, %v1496_v9  ;;  %v1499_v5 = vsel %vm1468_vm6, %v1496_v9, %v1498_v12 }
  0xb0   : > { %v1973_v54 = vsel %vm1812_vm5, %v1963_v35, %v1972_v19 }
  0xb3   : > { %4830 = vmatmul.mubr.msk.bf16.gmra.mxu1 %vm484_vm2, %v1489_v48  ;;  %v1502_v48 = vrot.slane %v5735_v10, 2 }
  0xb4   : > { %4872 = vmatmul.mubr.msk.bf16.gmra.mxu0 %vm484_vm2, %v1910_v36  ;;  %4833 = vmatprep.mubr.msk.bf16.mxu1 %vm484_vm2, %v1491_v53  ;;  %v1975_v36 = vshrl.u32 %v5751_v22, 16  ;;  %v1964_v53 = vsel %vm1812_vm5, %v1954_v2, %v1963_v35  ;;  %v5127_v2 = vld [vmem:[%s5228_s23 + $0xa8] ss:$0 sps:$4 sm:$0x33]  }
  0xb5   : > { %4875 = vmatprep.mubr.msk.bf16.mxu0 %vm484_vm2, %v1919_v31  ;;  %v1984_v31 = vshrl.u32 %v5755_v26, 16  ;;  %v1503_v15 = vsel %vm1468_vm6, %v1500_v41, %v1502_v48  ;;  %v1505_v62 = vsel %vm1468_vm6, %v1502_v48, %v1504_v47  ;;  %v1508_v9 = vrot.slane %v5127_v2, 2  ;;  %v5132_v35 = vld [vmem:[%s5228_s23 + $0x24] sm:$0xff]  }
  0xb6   : > { %v1977_v60 = vrot.slane %v1975_v36, 2 }
  0xb7   : > { %v1986_v44 = vrot.slane %v1984_v31, 2  ;;  %v1509_v8 = vsel %vm1468_vm6, %v1506_v50, %v1508_v9 }
  0xbb   : > { %4834 = vmatmul.mubr.msk.bf16.gmra.mxu1 %vm484_vm2, %v1493_v0 }
  0xbc   : > { %4876 = vmatmul.mubr.msk.bf16.gmra.mxu0 %vm484_vm2, %v1928_v57  ;;  %4837 = vmatprep.mubr.msk.bf16.mxu1 %vm484_vm2, %v1495_v29  ;;  %v1981_v57 = vor.u32 %v1980_v21, %v1977_v60  ;;  %v1995_v29 = vrot.slane %v1993_v51, 2  ;;  %v5134_v60 = vld [vmem:[%s5228_s23 + $0x34] sm:$0xff]   ;;  %v5136_v51 = vld [vmem:[%s5228_s23 + $0x44] sm:$0xff]  }
  0xbd   : > { %4879 = vmatprep.mubr.msk.bf16.mxu0 %vm484_vm2, %v1937_v32  ;;  %v1990_v32 = vor.u32 %v1989_v45, %v1986_v44 }
  0xbe   : > { %v1982_v0 = vsel %vm1812_vm5, %v1972_v19, %v1981_v57  ;;  %v1999_v23 = vor.u32 %v1998_v55, %v1995_v29  ;;  %v3793_v19 = vsel %vm545_vm0, %v5637_v17, 0  ;;  %v5137_v55 = vld [vmem:[%s5228_s23 + $0x4c] sm:$0xff]  }
  0xbf   : > { %v1991_v52 = vsel %vm1812_vm5, %v1981_v57, %v1990_v32  ;;  %v5135_v57 = vld [vmem:[%s5228_s23 + $0x3c] sm:$0xff]  }
  0xc0   : > { %v2000_v12 = vsel %vm1812_vm5, %v1990_v32, %v1999_v23 }
  0xc3   : > { %4838 = vmatmul.mubr.msk.bf16.gmra.mxu1 %vm484_vm2, %v1497_v34 }
  0xc4   : > { %4880 = vmatmul.mubr.msk.bf16.gmra.mxu0 %vm484_vm2, %v1946_v20  ;;  %4841 = vmatprep.mubr.msk.bf16.mxu1 %vm484_vm2, %v1499_v5  ;;  %v5130_v20 = vld [vmem:[%s5228_s23 + $0x14] sm:$0xff]   ;;  %v5131_v5 = vld [vmem:[%s5228_s23 + $0x1c] sm:$0xff]  }
  0xc5   : > { %4883 = vmatprep.mubr.msk.bf16.mxu0 %vm484_vm2, %v1955_v27 }
  0xcb   : > { %4842 = vmatmul.mubr.msk.bf16.gmra.mxu1 %vm484_vm2, %v1501_v56 }
  0xcc   : > { %4884 = vmatmul.mubr.msk.bf16.gmra.mxu0 %vm484_vm2, %v1964_v53  ;;  %4845 = vmatprep.mubr.msk.bf16.mxu1 %vm484_vm2, %v1503_v15 }
  0xcd   : > { %4887 = vmatprep.mubr.msk.bf16.mxu0 %vm484_vm2, %v1973_v54 }
  0xd3   : > { %4846 = vmatmul.mubr.msk.bf16.gmra.mxu1 %vm484_vm2, %v1505_v62 }
  0xd4   : > { %4888 = vmatmul.mubr.msk.bf16.gmra.mxu0 %vm484_vm2, %v1982_v0  ;;  %4849 = vmatprep.mubr.msk.bf16.mxu1 %vm484_vm2, %v1507_v3 }
  0xd5   : > { %4891 = vmatprep.mubr.msk.bf16.mxu0 %vm484_vm2, %v1991_v52  ;;  %v5138_v52 = vld [vmem:[%s5228_s23 + $0x54] sm:$0xff]  }
  0xdb   : > { %v5800_v27 = vpop.f32.mrf.mxu1  ;;  %4850 = vmatmul.mubr.msk.bf16.gmra.mxu1 %vm484_vm2, %v1509_v8  ;;  %v5140_v8 = vld [vmem:[%s5228_s23 + $0x64] sm:$0xff]  }
  0xdc   : > { %v5796_v43 = vpop.f32.mrf.mxu0  ;;  %4892 = vmatmul.mubr.msk.bf16.gmra.mxu0 %vm484_vm2, %v2000_v12  ;;  %4897 = vmatprep.mubr.msk.bf16.mxu1 %vm484_vm2, %v5492_v18  ;;  %v3450_v18 = vsel %vm545_vm0, %v5653_v4, 0  ;;  %v5133_v4 = vld [vmem:[%s5228_s23 + $0x2c] sm:$0xff]  }
  0xdd   : > { %4939 = vmatprep.mubr.msk.bf16.mxu0 %vm484_vm2, %v5130_v20  ;;  %v5807_v25 = vpop.f32.mrf.mxu1  ;;  %v5139_v20 = vld [vmem:[%s5228_s23 + $0x5c] sm:$0xff]  }
  0xde   : > { %v5803_v58 = vpop.f32.mrf.mxu0 }
  0xdf   : > { %v5813_v36 = vpop.f32.mrf.mxu1 }
  0xe0   : > { %v5809_v34 = vpop.f32.mrf.mxu0 }
  0xe1   : > { %v5819_v31 = vpop.f32.mrf.mxu1 }
  0xe2   : > { %v5815_v40 = vpop.f32.mrf.mxu0 }
  0xe3   : > { %v5827_v41 = vpop.f32.mrf.mxu1  ;;  %4898 = vmatmul.mubr.msk.bf16.vlgmr.msra.gmra.mxu1 %vm484_vm2, %v5484_v16 }
  0xe4   : > { %v5821_v61 = vpop.f32.mrf.mxu0  ;;  %4940 = vmatmul.mubr.msk.bf16.vlgmr.msra.gmra.mxu0 %vm484_vm2, %v5131_v5  ;;  %4980 = vmatpush3.bf16.msra.mxu1 %v3450_v18 }
  0xe5   : > { %5022 = vmatpush3.bf16.msra.mxu0 %v3793_v19  ;;  %4943 = vmatprep.mubr.msk.bf16.mxu0 %vm484_vm2, %v5132_v35  ;;  %v5835_v17 = vpop.f32.mrf.mxu1 }
  0xe6   : > { %v5831_v48 = vpop.f32.mrf.mxu0  ;;  %4901 = vmatprep.mubr.msk.bf16.mxu1 %vm484_vm2, %v5503_v13 }
  0xe7   : > { %v5841_v21 = vpop.f32.mrf.mxu1 }
  0xe8   : > { %v5837_v53 = vpop.f32.mrf.mxu0 }
  0xe9   : > { %v5845_v44 = vpop.f32.mrf.mxu1 }
  0xea   : > { %v5843_v54 = vpop.f32.mrf.mxu0 }
  0xeb   : > { %v5851_v13 = vpop.f32.mrf.mxu1  ;;  %4902 = vmatmul.mubr.msk.bf16.gmra.mxu1 %vm484_vm2, %v5509_v30 }
  0xec   : > { %v5847_v16 = vpop.f32.mrf.mxu0  ;;  %4944 = vmatmul.mubr.msk.bf16.gmra.mxu0 %vm484_vm2, %v5133_v4  ;;  %4905 = vmatprep.mubr.msk.bf16.mxu1 %vm484_vm2, %v5527_v14 }
  0xed   : > { %4947 = vmatprep.mubr.msk.bf16.mxu0 %vm484_vm2, %v5134_v60  ;;  %v5859_v56 = vpop.f32.mrf.mxu1 }
  0xee   : > { %v5855_v45 = vpop.f32.mrf.mxu0 }
  0xef   : > { %v5865_v39 = vpop.f32.mrf.mxu1 }
  0xf0   : > { %v5861_v15 = vpop.f32.mrf.mxu0 }
  0xf1   : > { %v5869_v47 = vpop.f32.mrf.mxu1 }
  0xf2   : > { %v5867_v32 = vpop.f32.mrf.mxu0 }
  0xf3   : > { %v5875_v14 = vpop.f32.mrf.mxu1  ;;  %4906 = vmatmul.mubr.msk.bf16.gmra.mxu1 %vm484_vm2, %v5534_v46 }
  0xf4   : > { %v5871_v30 = vpop.f32.mrf.mxu0  ;;  %4948 = vmatmul.mubr.msk.bf16.gmra.mxu0 %vm484_vm2, %v5135_v57  ;;  %4909 = vmatprep.mubr.msk.bf16.mxu1 %vm484_vm2, %v5552_v37 }
  0xf5   : > { %4951 = vmatprep.mubr.msk.bf16.mxu0 %vm484_vm2, %v5136_v51  ;;  %v5883_v0 = vpop.f32.mrf.mxu1  ;;  %v5141_v51 = vld [vmem:[%s5228_s23 + $0x6c] sm:$0xff]  }
  0xf6   : > { %v5879_v50 = vpop.f32.mrf.mxu0 }
  0xf7   : > { %v5889_v62 = vpop.f32.mrf.mxu1 }
  0xf8   : > { %v5885_v29 = vpop.f32.mrf.mxu0 }
  0xf9   : > { %v5893_v3 = vpop.f32.mrf.mxu1 }
  0xfa   : > { %v5891_v2 = vpop.f32.mrf.mxu0 }
  0xfb   : > { %v5899_v37 = vpop.f32.mrf.mxu1  ;;  %4910 = vmatmul.mubr.msk.bf16.gmra.mxu1 %vm484_vm2, %v5559_v7 }
  0xfc   : > { %v5895_v46 = vpop.f32.mrf.mxu0  ;;  %4952 = vmatmul.mubr.msk.bf16.gmra.mxu0 %vm484_vm2, %v5137_v55  ;;  %4913 = vmatprep.mubr.msk.bf16.mxu1 %vm484_vm2, %v5578_v11 }
  0xfd   : > { %4955 = vmatprep.mubr.msk.bf16.mxu0 %vm484_vm2, %v5138_v52  ;;  %v5907_v9 = vpop.f32.mrf.mxu1 }
  0xfe   : > { %v5903_v23 = vpop.f32.mrf.mxu0 }
  0xff   : > { %v5913_v5 = vpop.f32.mrf.mxu1 }
 0x100   : > { %v5909_v12 = vpop.f32.mrf.mxu0  ;;  %6661 = vst [vmem:[#allocation2_spill] sm:$0xff] %v5913_v5 }
 0x101   : > { %v5917_v19 = vpop.f32.mrf.mxu1 }
 0x102   : > { %v5915_v35 = vpop.f32.mrf.mxu0  ;;  %6662 = vst [vmem:[#allocation3_spill] sm:$0xff] %v5917_v19 }
 0x103   : > { %v4731_v11 = vpop.f32.mrf.mxu1  ;;  %4914 = vmatmul.mubr.msk.bf16.gmra.mxu1 %vm484_vm2, %v5585_v38 }
 0x104   : > { %v4773_v7 = vpop.f32.mrf.mxu0  ;;  %4956 = vmatmul.mubr.msk.bf16.gmra.mxu0 %vm484_vm2, %v5139_v20  ;;  %v828_v4 = vadd.f32 %v4731_v11, %v5796_v43  ;;  %4917 = vmatprep.mubr.msk.bf16.mxu1 %vm484_vm2, %v5607_v24  ;;  %v5142_v20 = vld [vmem:[%s5228_s23 + $0x74] sm:$0xff]  }
 0x105   : > { %4959 = vmatprep.mubr.msk.bf16.mxu0 %vm484_vm2, %v5140_v8  ;;  %v819_v60 = vpop.f32.mrf.mxu1 }
 0x106   : > { %v1123_v18 = vpop.f32.mrf.mxu0  ;;  %v5927_v55 = vadd.f32 %v4773_v7, %v828_v4  ;;  %v820_v52 = vadd.f32 %v819_v60, %v5803_v58  ;;  %v5143_v60 = vld [vmem:[%s5228_s23 + $0x7c] sm:$0xff]  }
 0x107   : > { %v4732_v63 = vpop.f32.mrf.mxu1 }
 0x108   : > { %v4774_v57 = vpop.f32.mrf.mxu0  ;;  %v5931_v19 = vadd.f32 %v1123_v18, %v820_v52  ;;  %v831_v38 = vadd.f32 %v4732_v63, %v5809_v34 }
 0x109   : > { %v822_v5 = vpop.f32.mrf.mxu1 }
 0x10a   : > { %v1126_v8 = vpop.f32.mrf.mxu0  ;;  %v5935_v24 = vadd.f32 %v4774_v57, %v831_v38  ;;  %v823_v7 = vadd.f32 %v822_v5, %v5815_v40  ;;  %v2333_v57 = vrot.slane %v5715_v42, 3 }
 0x10b   : > { %v4735_v58 = vpop.f32.mrf.mxu1  ;;  %4918 = vmatmul.mubr.msk.bf16.gmra.mxu1 %vm484_vm2, %v5613_v49 }
 0x10c   : > { %v4777_v43 = vpop.f32.mrf.mxu0  ;;  %4960 = vmatmul.mubr.msk.bf16.gmra.mxu0 %vm484_vm2, %v5141_v51  ;;  %v5941_v18 = vadd.f32 %v1126_v8, %v823_v7  ;;  %v844_v63 = vadd.f32 %v4735_v58, %v5821_v61  ;;  %4921 = vmatprep.mubr.msk.bf16.mxu1 %vm484_vm2, %v5645_v1  ;;  %v5144_v51 = vld [vmem:[%s5228_s23 + $0x84] sm:$0xff]   ;;  %v6663_v1 = vrot.slane %v5629_v28, 3 }
 0x10d   : > { %4963 = vmatprep.mubr.msk.bf16.mxu0 %vm484_vm2, %v5142_v20  ;;  %v835_v34 = vpop.f32.mrf.mxu1 }
 0x10e   : > { %v1139_v11 = vpop.f32.mrf.mxu0  ;;  %v5948_v40 = vadd.f32 %v4777_v43, %v844_v63  ;;  %v836_v5 = vadd.f32 %v835_v34, %v5831_v48  ;;  %v2334_v42 = vsel %vm2303_vm4, %v6663_v1, %v2333_v57 }
 0x10f   : > { %v4736_v52 = vpop.f32.mrf.mxu1 }
 0x110   : > { %v4778_v4 = vpop.f32.mrf.mxu0  ;;  %v5952_v20 = vadd.f32 %v1139_v11, %v836_v5  ;;  %v847_v8 = vadd.f32 %v4736_v52, %v5837_v53  ;;  %v2335_v11 = vrot.slane %v5731_v59, 3  ;;  %v3080_v52 = vld [vmem:[%s5228_s23 + $0x18] sm:$0xf] }
 0x111   : > { %v838_v61 = vpop.f32.mrf.mxu1 }
 0x112   : > { %v1142_v49 = vpop.f32.mrf.mxu0  ;;  %v5959_v43 = vadd.f32 %v4778_v4, %v847_v8  ;;  %v839_v48 = vadd.f32 %v838_v61, %v5843_v54  ;;  %v5145_v54 = vld [vmem:[%s5228_s23 + $0x8c] sm:$0xff]   ;;  %v2337_v4 = vrot.slane %v5735_v10, 3  ;;  %v2336_v59 = vsel %vm2303_vm4, %v2333_v57, %v2335_v11 }
 0x113   : > { %v4739_v7 = vpop.f32.mrf.mxu1  ;;  %4922 = vmatmul.mubr.msk.bf16.gmra.mxu1 %vm484_vm2, %v5658_v33  ;;  %v3079_v33 = vld [vmem:[%s5228_s23 + $0x14] sm:$0xf] }
 0x114   : > { %v4781_v38 = vpop.f32.mrf.mxu0  ;;  %4964 = vmatmul.mubr.msk.bf16.gmra.mxu0 %vm484_vm2, %v5143_v60  ;;  %v5965_v58 = vadd.f32 %v1142_v49, %v839_v48  ;;  %v860_v28 = vadd.f32 %v4739_v7, %v5847_v16  ;;  %4925 = vmatprep.mubr.msk.bf16.mxu1 %vm484_vm2, %v2334_v42  ;;  %v2338_v10 = vsel %vm2303_vm4, %v2335_v11, %v2337_v4  ;;  %v3685_v11 = vld [vmem:[%s5228_s23 + $0x14] sm:$0xe] }
 0x115   : > { %4967 = vmatprep.mubr.msk.bf16.mxu0 %vm484_vm2, %v5144_v51  ;;  %v851_v63 = vpop.f32.mrf.mxu1  ;;  %v5146_v51 = vld [vmem:[%s5228_s23 + $0x94] sm:$0xff]  }
 0x116   : > { %v1155_v53 = vpop.f32.mrf.mxu0  ;;  %v5972_v60 = vadd.f32 %v4781_v38, %v860_v28  ;;  %v852_v5 = vadd.f32 %v851_v63, %v5855_v45  ;;  %v4430_v45 = vcombine.low %v3079_v33, %v3080_v52  ;;  %v2339_v28 = vrot.slane %v5751_v22, 3 }
 0x117   : > { %v4740_v49 = vpop.f32.mrf.mxu1 }
 0x118   : > { %v4782_v34 = vpop.f32.mrf.mxu0  ;;  %v5978_v61 = vadd.f32 %v1155_v53, %v852_v5  ;;  %v863_v16 = vadd.f32 %v4740_v49, %v5861_v15  ;;  %v5998_v5 = vld [vmem:[%s5228_s23 + $0x1c] sm:$0xff]  }
 0x119   : > { %v854_v1 = vpop.f32.mrf.mxu1 }
 0x11a   : > { %v1158_v8 = vpop.f32.mrf.mxu0  ;;  %v5984_v38 = vadd.f32 %v4782_v34, %v863_v16  ;;  %v855_v48 = vadd.f32 %v854_v1, %v5867_v32  ;;  %v2341_v32 = vrot.slane %v5755_v26, 3 }
 0x11b   : > { %v4743_v7 = vpop.f32.mrf.mxu1  ;;  %4926 = vmatmul.mubr.msk.bf16.gmra.mxu1 %vm484_vm2, %v2336_v59  ;;  %v4472_v59 = vcombine.low %v3685_v11, %v3080_v52  ;;  %v3692_v11 = vrot.slane %v5998_v5, 1 }
 0x11c   : > { %v4785_v42 = vpop.f32.mrf.mxu0  ;;  %4968 = vmatmul.mubr.msk.bf16.gmra.mxu0 %vm484_vm2, %v5145_v54  ;;  %v5989_v57 = vadd.f32 %v1158_v8, %v855_v48  ;;  %v876_v53 = vadd.f32 %v4743_v7, %v5871_v30  ;;  %4929 = vmatprep.mubr.msk.bf16.mxu1 %vm484_vm2, %v2338_v10  ;;  %v5147_v54 = vld [vmem:[%s5228_s23 + $0x9c] sm:$0xff]   ;;  %v5148_v8 = vld [vmem:[%s5228_s23 + $0xa4] sm:$0xff]   ;;  %v2340_v10 = vsel %vm2303_vm4, %v2337_v4, %v2339_v28  ;;  %v3226_v7 = vshrl.u32 %v4430_v45, 16 }
 0x11d   : > { %4971 = vmatprep.mubr.msk.bf16.mxu0 %vm484_vm2, %v5146_v51  ;;  %v867_v63 = vpop.f32.mrf.mxu1  ;;  %v3228_v51 = vshll.u32 %v4430_v45, 16 }
 0x11e   : > { %v1171_v15 = vpop.f32.mrf.mxu0  ;;  %v6000_v33 = vadd.f32 %v4785_v42, %v876_v53  ;;  %v868_v49 = vadd.f32 %v867_v63, %v5879_v50  ;;  %v2342_v42 = vsel %vm2303_vm4, %v2339_v28, %v2341_v32  ;;  %v3233_v50 = vshll.u32 %v5998_v5, 16  ;;  %v5153_v28 = vld [vmem:[%s5228_s23 + $0x24] sm:$0xff]  }
 0x11f   : > { %v4744_v16 = vpop.f32.mrf.mxu1  ;;  %v3230_v53 = vrot.slane %v3228_v51, 1 }
 0x120   : > { %v4786_v34 = vpop.f32.mrf.mxu0  ;;  %v6004_v1 = vadd.f32 %v1171_v15, %v868_v49  ;;  %v879_v22 = vadd.f32 %v4744_v16, %v5885_v29  ;;  %v3691_v15 = vrot.slane %v4472_v59, 1  ;;  %v5149_v49 = vld [vmem:[%s5228_s23 + $0xac] sm:$0xff]   ;;  %v3235_v16 = vrot.slane %v3233_v50, 1 }
 0x121   : > { %v870_v48 = vpop.f32.mrf.mxu1 }
 0x122   : > { %v1174_v30 = vpop.f32.mrf.mxu0  ;;  %v6011_v63 = vadd.f32 %v4786_v34, %v879_v22  ;;  %v871_v52 = vadd.f32 %v870_v48, %v5891_v2  ;;  %v2343_v34 = vrot.slane %v5771_v6, 3  ;;  %v6025_v22 = vld [vmem:[%s5228_s23 + $0x2c] sm:$0xff]  }
 0x123   : > { %v4747_v29 = vpop.f32.mrf.mxu1  ;;  %4930 = vmatmul.mubr.msk.bf16.gmra.mxu1 %vm484_vm2, %v2340_v10 }
 0x124   : > { %v4789_v26 = vpop.f32.mrf.mxu0  ;;  %4972 = vmatmul.mubr.msk.bf16.gmra.mxu0 %vm484_vm2, %v5147_v54  ;;  %v6018_v45 = vadd.f32 %v1174_v30, %v871_v52  ;;  %v892_v54 = vadd.f32 %v4747_v29, %v5895_v46  ;;  %4933 = vmatprep.mubr.msk.bf16.mxu1 %vm484_vm2, %v2342_v42  ;;  %v3693_v52 = vsel %vm984_vm3, %v3691_v15, %v3692_v11  ;;  %v3241_v46 = vshll.u32 %v5153_v28, 16 }
 0x125   : > { %4975 = vmatprep.mubr.msk.bf16.mxu0 %vm484_vm2, %v5148_v8  ;;  %v883_v2 = vpop.f32.mrf.mxu1  ;;  %v3231_v8 = vor.u32 %v3230_v53, %v3226_v7  ;;  %v2344_v42 = vsel %vm2303_vm4, %v2341_v32, %v2343_v34  ;;  %v3237_v7 = vshrl.u32 %v5998_v5, 16 }
 0x126   : > { %v1187_v4 = vpop.f32.mrf.mxu0  ;;  %v6027_v10 = vadd.f32 %v4789_v26, %v892_v54  ;;  %v884_v59 = vadd.f32 %v883_v2, %v5903_v23  ;;  %v3245_v26 = vshrl.u32 %v5153_v28, 16  ;;  %v3249_v54 = vshll.u32 %v6025_v22, 16 }
 0x127   : > { %v4748_v48 = vpop.f32.mrf.mxu1  ;;  %v3236_v23 = vsel %vm319_vm1, %v3231_v8, %v3235_v16  ;;  %v3243_v34 = vrot.slane %v3241_v46, 1  ;;  %v3696_v2 = vrot.slane %v6025_v22, 1 }
 0x128   : > { %v4790_v51 = vpop.f32.mrf.mxu0  ;;  %v6031_v29 = vadd.f32 %v1187_v4, %v884_v59  ;;  %v895_v6 = vadd.f32 %v4748_v48, %v5909_v12  ;;  %v3694_v12 = vrot.slane %v5153_v28, 1  ;;  %v6051_v28 = vld [vmem:[%s5228_s23 + $0x3c] sm:$0xff]  }
 0x129   : > { %v886_v53 = vpop.f32.mrf.mxu1 }
 0x12a   : > { %v1190_v30 = vpop.f32.mrf.mxu0  ;;  %v6039_v15 = vadd.f32 %v4790_v51, %v895_v6  ;;  %v887_v4 = vadd.f32 %v886_v53, %v5915_v35  ;;  %v3239_v51 = vor.u32 %v3237_v7, %v3235_v16  ;;  %v3251_v6 = vrot.slane %v3249_v54, 1 }
 0x12b   : > { %v4751_v32 = vpop.f32.mrf.mxu1  ;;  %4934 = vmatmul.mubr.msk.bf16.gmra.mxu1 %vm484_vm2, %v2344_v42  ;;  %v3695_v42 = vsel %vm984_vm3, %v3692_v11, %v3694_v12 }
 0x12c   : > { %v4793_v50 = vpop.f32.mrf.mxu0  ;;  %4976 = vmatmul.mubr.msk.bf16.gmra.mxu0 %vm484_vm2, %v5149_v49  ;;  %6664 = vst [vmem:[#allocation4_spill] sm:$0xff] %v6039_v15  ;;  %v5155_v49 = vld [vmem:[%s5228_s23 + $0x34] sm:$0xff]   ;;  %v6046_v8 = vadd.f32 %v1190_v30, %v887_v4  ;;  %v908_v59 = vadd.f32 %v4751_v32, %v5800_v27  ;;  %4981 = vmatprep.mubr.msk.bf16.mxu1 %vm484_vm2, %v3236_v23  ;;  %v3265_v32 = vshll.u32 %v6051_v28, 16 }
 0x12d   : > { %5023 = vmatprep.mubr.msk.bf16.mxu0 %vm484_vm2, %v3693_v52  ;;  %v899_v35 = vpop.f32.mrf.mxu1  ;;  %v3247_v52 = vor.u32 %v3245_v26, %v3243_v34  ;;  %v3697_v4 = vsel %vm984_vm3, %v3694_v12, %v3696_v2  ;;  %v3257_v27 = vshll.u32 %v5155_v49, 16  ;;  %v3244_v23 = vsel %vm319_vm1, %v3239_v51, %v3243_v34  ;;  %v5157_v51 = vld [vmem:[%s5228_s23 + $0x44] sm:$0xff]  }
 0x12e   : > { %v1203_v5 = vpop.f32.mrf.mxu0  ;;  %v6053_v53 = vadd.f32 %v4793_v50, %v908_v59  ;;  %v900_v46 = vadd.f32 %v899_v35, %v5807_v25  ;;  %v3253_v26 = vshrl.u32 %v6025_v22, 16  ;;  %v3261_v11 = vshrl.u32 %v5155_v49, 16 }
 0x12f   : > { %v4752_v15 = vpop.f32.mrf.mxu1  ;;  %v3252_v25 = vsel %vm319_vm1, %v3247_v52, %v3251_v6  ;;  %v3259_v34 = vrot.slane %v3257_v27, 1  ;;  %v3700_v59 = vrot.slane %v6051_v28, 1 }
 0x130   : > { %v4794_v48 = vpop.f32.mrf.mxu0  ;;  %v6058_v16 = vadd.f32 %v1203_v5, %v900_v46  ;;  %v911_v7 = vadd.f32 %v4752_v15, %v5813_v36  ;;  %v3698_v36 = vrot.slane %v5155_v49, 1  ;;  %v6078_v49 = vld [vmem:[%s5228_s23 + $0x4c] sm:$0xff]  }
 0x131   : > { %v902_v50 = vpop.f32.mrf.mxu1 }
 0x132   : > { %v1206_v30 = vpop.f32.mrf.mxu0  ;;  %v6066_v12 = vadd.f32 %v4794_v48, %v911_v7  ;;  %v903_v5 = vadd.f32 %v902_v50, %v5819_v31  ;;  %v3255_v48 = vor.u32 %v3253_v26, %v3251_v6 }
 0x133   : > { %v4755_v15 = vpop.f32.mrf.mxu1  ;;  %4982 = vmatmul.mubr.msk.bf16.vlgmr.msra.gmra.mxu1 %vm484_vm2, %v3244_v23  ;;  %v3699_v23 = vsel %vm984_vm3, %v3696_v2, %v3698_v36  ;;  %v3277_v2 = vshrl.u32 %v5157_v51, 16 }
 0x134   : > { %v4797_v54 = vpop.f32.mrf.mxu0  ;;  %5024 = vmatmul.mubr.msk.bf16.vlgmr.msra.gmra.mxu0 %vm484_vm2, %v3695_v42  ;;  %v6073_v35 = vadd.f32 %v1206_v30, %v903_v5  ;;  %v924_v52 = vadd.f32 %v4755_v15, %v5827_v41  ;;  %4985 = vmatprep.mubr.msk.bf16.mxu1 %vm484_vm2, %v3252_v25  ;;  %v3263_v42 = vor.u32 %v3261_v11, %v3259_v34  ;;  %v3273_v41 = vshll.u32 %v5157_v51, 16 }
 0x135   : > { %5027 = vmatprep.mubr.msk.bf16.mxu0 %vm484_vm2, %v3697_v4  ;;  %v915_v31 = vpop.f32.mrf.mxu1  ;;  %v3267_v4 = vrot.slane %v3265_v32, 1  ;;  %v3701_v5 = vsel %vm984_vm3, %v3698_v36, %v3700_v59  ;;  %v3260_v25 = vsel %vm319_vm1, %v3255_v48, %v3259_v34  ;;  %v3269_v11 = vshrl.u32 %v6051_v28, 16 }
 0x136   : > { %v1219_v22 = vpop.f32.mrf.mxu0  ;;  %v6080_v7 = vadd.f32 %v4797_v54, %v924_v52  ;;  %v916_v27 = vadd.f32 %v915_v31, %v5835_v17  ;;  %v3281_v15 = vshll.u32 %v6078_v49, 16  ;;  %v3275_v52 = vrot.slane %v3273_v41, 1  ;;  %v5159_v31 = vld [vmem:[%s5228_s23 + $0x54] sm:$0xff]  }
 0x137   : > { %v4756_v50 = vpop.f32.mrf.mxu1  ;;  %v3268_v17 = vsel %vm319_vm1, %v3263_v42, %v3267_v4  ;;  %v3704_v48 = vrot.slane %v6078_v49, 1 }
 0x138   : > { %v4798_v46 = vpop.f32.mrf.mxu0  ;;  %v6085_v6 = vadd.f32 %v1219_v22, %v916_v27  ;;  %v927_v26 = vadd.f32 %v4756_v50, %v5841_v21  ;;  %v3702_v21 = vrot.slane %v5157_v51, 1  ;;  %v3279_v50 = vor.u32 %v3277_v2, %v3275_v52  ;;  %v6105_v51 = vld [vmem:[%s5228_s23 + $0x5c] sm:$0xff]  }
 0x139   : > { %v918_v54 = vpop.f32.mrf.mxu1  ;;  %v3285_v2 = vshrl.u32 %v6078_v49, 16 }
 0x13a   : > { %v1222_v30 = vpop.f32.mrf.mxu0  ;;  %v6093_v36 = vadd.f32 %v4798_v46, %v927_v26  ;;  %v919_v22 = vadd.f32 %v918_v54, %v5845_v44  ;;  %v3271_v46 = vor.u32 %v3269_v11, %v3267_v4 }
 0x13b   : > { %v4759_v34 = vpop.f32.mrf.mxu1  ;;  %4986 = vmatmul.mubr.msk.bf16.gmra.mxu1 %vm484_vm2, %v3260_v25  ;;  %v3703_v25 = vsel %vm984_vm3, %v3700_v59, %v3702_v21  ;;  %v3293_v59 = vshrl.u32 %v5159_v31, 16 }
 0x13c   : > { %v4801_v32 = vpop.f32.mrf.mxu0  ;;  %5028 = vmatmul.mubr.msk.bf16.gmra.mxu0 %vm484_vm2, %v3699_v23  ;;  %v6100_v42 = vadd.f32 %v1222_v30, %v919_v22  ;;  %v940_v27 = vadd.f32 %v4759_v34, %v5851_v13  ;;  %4989 = vmatprep.mubr.msk.bf16.mxu1 %vm484_vm2, %v3268_v17  ;;  %v3705_v22 = vsel %vm984_vm3, %v3702_v21, %v3704_v48  ;;  %v3289_v13 = vshll.u32 %v5159_v31, 16 }
 0x13d   : > { %5031 = vmatprep.mubr.msk.bf16.mxu0 %vm484_vm2, %v3701_v5  ;;  %v931_v44 = vpop.f32.mrf.mxu1  ;;  %v3283_v5 = vrot.slane %v3281_v15, 1  ;;  %v3276_v17 = vsel %vm319_vm1, %v3271_v46, %v3275_v52  ;;  %v3297_v34 = vshll.u32 %v6105_v51, 16  ;;  %v3708_v46 = vrot.slane %v6105_v51, 1 }
 0x13e   : > { %v1235_v28 = vpop.f32.mrf.mxu0  ;;  %v6107_v26 = vadd.f32 %v4801_v32, %v940_v27  ;;  %v932_v41 = vadd.f32 %v931_v44, %v5859_v56  ;;  %v3291_v27 = vrot.slane %v3289_v13, 1  ;;  %v5161_v44 = vld [vmem:[%s5228_s23 + $0x64] sm:$0xff]  }
 0x13f   : > { %v4760_v54 = vpop.f32.mrf.mxu1  ;;  %v3284_v56 = vsel %vm319_vm1, %v3279_v50, %v3283_v5 }
 0x140   : > { %v4802_v23 = vpop.f32.mrf.mxu0  ;;  %v6112_v4 = vadd.f32 %v1235_v28, %v932_v41  ;;  %v943_v11 = vadd.f32 %v4760_v54, %v5865_v39  ;;  %v3706_v39 = vrot.slane %v5159_v31, 1  ;;  %v3295_v54 = vor.u32 %v3293_v59, %v3291_v27  ;;  %v6132_v31 = vld [vmem:[%s5228_s23 + $0x6c] sm:$0xff]  }
 0x141   : > { %v934_v32 = vpop.f32.mrf.mxu1  ;;  %v3301_v59 = vshrl.u32 %v6105_v51, 16 }
 0x142   : > { %v1238_v30 = vpop.f32.mrf.mxu0  ;;  %v6120_v21 = vadd.f32 %v4802_v23, %v943_v11  ;;  %v935_v28 = vadd.f32 %v934_v32, %v5869_v47  ;;  %v3287_v23 = vor.u32 %v3285_v2, %v3283_v5 }
 0x143   : > { %v4763_v52 = vpop.f32.mrf.mxu1  ;;  %4990 = vmatmul.mubr.msk.bf16.gmra.mxu1 %vm484_vm2, %v3276_v17  ;;  %v3707_v17 = vsel %vm984_vm3, %v3704_v48, %v3706_v39  ;;  %v3309_v48 = vshrl.u32 %v5161_v44, 16 }
 0x144   : > { %v4805_v15 = vpop.f32.mrf.mxu0  ;;  %5032 = vmatmul.mubr.msk.bf16.gmra.mxu0 %vm484_vm2, %v3703_v25  ;;  %v6127_v50 = vadd.f32 %v1238_v30, %v935_v28  ;;  %v956_v41 = vadd.f32 %v4763_v52, %v5875_v14  ;;  %4993 = vmatprep.mubr.msk.bf16.mxu1 %vm484_vm2, %v3284_v56  ;;  %v3709_v28 = vsel %vm984_vm3, %v3706_v39, %v3708_v46  ;;  %v3305_v14 = vshll.u32 %v5161_v44, 16 }
 0x145   : > { %5035 = vmatprep.mubr.msk.bf16.mxu0 %vm484_vm2, %v3705_v22  ;;  %v947_v47 = vpop.f32.mrf.mxu1  ;;  %v3299_v22 = vrot.slane %v3297_v34, 1  ;;  %v3292_v56 = vsel %vm319_vm1, %v3287_v23, %v3291_v27  ;;  %v3313_v52 = vshll.u32 %v6132_v31, 16  ;;  %v3712_v23 = vrot.slane %v6132_v31, 1 }
 0x146   : > { %v1251_v49 = vpop.f32.mrf.mxu0  ;;  %v6134_v11 = vadd.f32 %v4805_v15, %v956_v41  ;;  %v948_v13 = vadd.f32 %v947_v47, %v5883_v0  ;;  %v3307_v41 = vrot.slane %v3305_v14, 1  ;;  %v5163_v47 = vld [vmem:[%s5228_s23 + $0x74] sm:$0xff]  }
 0x147   : > { %v4764_v32 = vpop.f32.mrf.mxu1  ;;  %v3300_v0 = vsel %vm319_vm1, %v3295_v54, %v3299_v22 }
 0x148   : > { %v4806_v25 = vpop.f32.mrf.mxu0  ;;  %v6139_v5 = vadd.f32 %v1251_v49, %v948_v13  ;;  %v959_v2 = vadd.f32 %v4764_v32, %v5889_v62  ;;  %v3710_v62 = vrot.slane %v5161_v44, 1  ;;  %v3311_v32 = vor.u32 %v3309_v48, %v3307_v41  ;;  %v6159_v44 = vld [vmem:[%s5228_s23 + $0x7c] sm:$0xff]  }
 0x149   : > { %v950_v15 = vpop.f32.mrf.mxu1 }
 0x14a   : > { %v1254_v30 = vpop.f32.mrf.mxu0  ;;  %v6147_v39 = vadd.f32 %v4806_v25, %v959_v2  ;;  %v951_v49 = vadd.f32 %v950_v15, %v5893_v3  ;;  %v3303_v25 = vor.u32 %v3301_v59, %v3299_v22  ;;  %v6666_v59 = vld [vmem:[#allocation2_spill] sm:$0xff] }
 0x14b   : > { %v4767_v27 = vpop.f32.mrf.mxu1  ;;  %4994 = vmatmul.mubr.msk.bf16.gmra.mxu1 %vm484_vm2, %v3292_v56  ;;  %v3711_v56 = vsel %vm984_vm3, %v3708_v46, %v3710_v62  ;;  %v3325_v46 = vshrl.u32 %v5163_v47, 16 }
 0x14c   : > { %v4809_v34 = vpop.f32.mrf.mxu0  ;;  %5036 = vmatmul.mubr.msk.bf16.gmra.mxu0 %vm484_vm2, %v3707_v17  ;;  %v6154_v54 = vadd.f32 %v1254_v30, %v951_v49  ;;  %v972_v13 = vadd.f32 %v4767_v27, %v5899_v37  ;;  %4997 = vmatprep.mubr.msk.bf16.mxu1 %vm484_vm2, %v3300_v0  ;;  %v3713_v49 = vsel %vm984_vm3, %v3710_v62, %v3712_v23  ;;  %v3321_v37 = vshll.u32 %v5163_v47, 16 }
 0x14d   : > { %5039 = vmatprep.mubr.msk.bf16.mxu0 %vm484_vm2, %v3709_v28  ;;  %v963_v3 = vpop.f32.mrf.mxu1  ;;  %v3315_v28 = vrot.slane %v3313_v52, 1  ;;  %v3308_v48 = vsel %vm319_vm1, %v3303_v25, %v3307_v41  ;;  %v3317_v52 = vshrl.u32 %v6132_v31, 16  ;;  %v3714_v41 = vrot.slane %v5163_v47, 1  ;;  %v6186_v47 = vld [vmem:[%s5228_s23 + $0x8c] sm:$0xff]  }
 0x14e   : > { %v1267_v51 = vpop.f32.mrf.mxu0  ;;  %v6161_v2 = vadd.f32 %v4809_v34, %v972_v13  ;;  %v964_v14 = vadd.f32 %v963_v3, %v5907_v9  ;;  %v3329_v13 = vshll.u32 %v6159_v44, 16 }
 0x14f   : > { %v4768_v15 = vpop.f32.mrf.mxu1  ;;  %v3316_v9 = vsel %vm319_vm1, %v3311_v32, %v3315_v28 }
 0x150   : > { %v4810_v17 = vpop.f32.mrf.mxu0  ;;  %v6166_v22 = vadd.f32 %v1267_v51, %v964_v14  ;;  %v975_v0 = vadd.f32 %v4768_v15, %v6666_v59  ;;  %v6668_v51 = vld [vmem:[#allocation3_spill] sm:$0xff]  ;;  %v3323_v14 = vrot.slane %v3321_v37, 1 }
 0x151   : > { %v966_v34 = vpop.f32.mrf.mxu1  ;;  %v5165_v15 = vld [vmem:[%s5228_s23 + $0x84] sm:$0xff]  }
 0x152   : > { %v1270_v30 = vpop.f32.mrf.mxu0  ;;  %6665 = vst [vmem:[#allocation5_spill] sm:$0xff] %v6166_v22  ;;  %v6174_v62 = vadd.f32 %v4810_v17, %v975_v0  ;;  %v967_v3 = vadd.f32 %v966_v34, %v6668_v51  ;;  %v3319_v17 = vor.u32 %v3317_v52, %v3315_v28  ;;  %v3331_v51 = vrot.slane %v3329_v13, 1 }
 0x153   : > { %v4815_v25 = vpop.f32.mrf.mxu1  ;;  %4998 = vmatmul.mubr.msk.bf16.gmra.mxu1 %vm484_vm2, %v3308_v48  ;;  %v3715_v48 = vsel %vm984_vm3, %v3712_v23, %v3714_v41  ;;  %v3341_v23 = vshrl.u32 %v5165_v15, 16 }
 0x154   : > { %v4857_v27 = vpop.f32.mrf.mxu0  ;;  %5040 = vmatmul.mubr.msk.bf16.gmra.mxu0 %vm484_vm2, %v3711_v56  ;;  %6667 = vst [vmem:[#allocation2_spill] sm:$0xff] %v6174_v62  ;;  %v3716_v56 = vrot.slane %v6159_v44, 1  ;;  %v6181_v32 = vadd.f32 %v1270_v30, %v967_v3  ;;  %v1768_v59 = vadd.f32 %v4815_v25, %v5927_v55  ;;  %5001 = vmatprep.mubr.msk.bf16.mxu1 %vm484_vm2, %v3316_v9  ;;  %v3337_v55 = vshll.u32 %v5165_v15, 16 }
 0x155   : > { %5043 = vmatprep.mubr.msk.bf16.mxu0 %vm484_vm2, %v3713_v49  ;;  %v1607_v0 = vpop.f32.mrf.mxu1  ;;  %v3327_v49 = vor.u32 %v3325_v46, %v3323_v14  ;;  %v3324_v9 = vsel %vm319_vm1, %v3319_v17, %v3323_v14  ;;  %v3333_v46 = vshrl.u32 %v6159_v44, 16  ;;  %v3345_v25 = vshll.u32 %v6186_v47, 16  ;;  %v5167_v17 = vld [vmem:[%s5228_s23 + $0x94] sm:$0xff]  }
 0x156   : > { %v2098_v31 = vpop.f32.mrf.mxu0  ;;  %v6188_v62 = vadd.f32 %v4857_v27, %v1768_v59  ;;  %v1766_v37 = vadd.f32 %v1607_v0, %v5931_v19  ;;  %v3717_v3 = vsel %vm984_vm3, %v3714_v41, %v3716_v56  ;;  %v3339_v14 = vrot.slane %v3337_v55, 1 }
 0x157   : > { %v4816_v22 = vpop.f32.mrf.mxu1  ;;  %v3332_v19 = vsel %vm319_vm1, %v3327_v49, %v3331_v51  ;;  %v3720_v59 = vrot.slane %v6186_v47, 1 }
 0x158   : > { %v4858_v34 = vpop.f32.mrf.mxu0  ;;  %v6193_v28 = vadd.f32 %v2098_v31, %v1766_v37  ;;  %v1769_v52 = vadd.f32 %v4816_v22, %v5935_v24  ;;  %v3718_v24 = vrot.slane %v5165_v15, 1  ;;  %v6213_v15 = vld [vmem:[%s5228_s23 + $0x9c] sm:$0xff]  }
 0x159   : > { %v1610_v27 = vpop.f32.mrf.mxu1 }
 0x15a   : > { %v2101_v30 = vpop.f32.mrf.mxu0  ;;  %v6201_v41 = vadd.f32 %v4858_v34, %v1769_v52  ;;  %v1767_v31 = vadd.f32 %v1610_v27, %v5941_v18  ;;  %v3335_v34 = vor.u32 %v3333_v46, %v3331_v51 }
 0x15b   : > { %v4819_v22 = vpop.f32.mrf.mxu1  ;;  %5002 = vmatmul.mubr.msk.bf16.gmra.mxu1 %vm484_vm2, %v3324_v9  ;;  %v3719_v9 = vsel %vm984_vm3, %v3716_v56, %v3718_v24  ;;  %v3357_v56 = vshrl.u32 %v5167_v17, 16 }
 0x15c   : > { %v4861_v13 = vpop.f32.mrf.mxu0  ;;  %5044 = vmatmul.mubr.msk.bf16.gmra.mxu0 %vm484_vm2, %v3715_v48  ;;  %v6208_v0 = vadd.f32 %v2101_v30, %v1767_v31  ;;  %v1772_v49 = vadd.f32 %v4819_v22, %v5948_v40  ;;  %5005 = vmatprep.mubr.msk.bf16.mxu1 %vm484_vm2, %v3332_v19  ;;  %v3343_v48 = vor.u32 %v3341_v23, %v3339_v14  ;;  %v3353_v40 = vshll.u32 %v5167_v17, 16 }
 0x15d   : > { %5047 = vmatprep.mubr.msk.bf16.mxu0 %vm484_vm2, %v3717_v3  ;;  %v1623_v18 = vpop.f32.mrf.mxu1  ;;  %v3347_v3 = vrot.slane %v3345_v25, 1  ;;  %v3721_v31 = vsel %vm984_vm3, %v3718_v24, %v3720_v59  ;;  %v3340_v19 = vsel %vm319_vm1, %v3335_v34, %v3339_v14  ;;  %v3349_v23 = vshrl.u32 %v6186_v47, 16 }
 0x15e   : > { %v2114_v44 = vpop.f32.mrf.mxu0  ;;  %v6215_v52 = vadd.f32 %v4861_v13, %v1772_v49  ;;  %v1770_v55 = vadd.f32 %v1623_v18, %v5952_v20  ;;  %v3361_v22 = vshll.u32 %v6213_v15, 16  ;;  %v3355_v49 = vrot.slane %v3353_v40, 1  ;;  %v5169_v18 = vld [vmem:[%s5228_s23 + $0xa4] sm:$0xff]  }
 0x15f   : > { %v4820_v27 = vpop.f32.mrf.mxu1  ;;  %v3348_v20 = vsel %vm319_vm1, %v3343_v48, %v3347_v3  ;;  %v3724_v34 = vrot.slane %v6213_v15, 1 }
 0x160   : > { %v4862_v37 = vpop.f32.mrf.mxu0  ;;  %v6220_v51 = vadd.f32 %v2114_v44, %v1770_v55  ;;  %v1773_v46 = vadd.f32 %v4820_v27, %v5959_v43  ;;  %v3722_v43 = vrot.slane %v5167_v17, 1  ;;  %v3359_v27 = vor.u32 %v3357_v56, %v3355_v49  ;;  %v6240_v17 = vld [vmem:[%s5228_s23 + $0xac] sm:$0xff]  }
 0x161   : > { %v1626_v13 = vpop.f32.mrf.mxu1 }
 0x162   : > { %v2117_v30 = vpop.f32.mrf.mxu0  ;;  %v6228_v24 = vadd.f32 %v4862_v37, %v1773_v46  ;;  %v1771_v44 = vadd.f32 %v1626_v13, %v5965_v58  ;;  %v3351_v37 = vor.u32 %v3349_v23, %v3347_v3  ;;  %v3369_v3 = vshll.u32 %v5169_v18, 16 }
 0x163   : > { %v4823_v14 = vpop.f32.mrf.mxu1  ;;  %5006 = vmatmul.mubr.msk.bf16.gmra.mxu1 %vm484_vm2, %v3340_v19  ;;  %v3723_v19 = vsel %vm984_vm3, %v3720_v59, %v3722_v43  ;;  %v3373_v59 = vshrl.u32 %v5169_v18, 16 }
 0x164   : > { %v4865_v25 = vpop.f32.mrf.mxu0  ;;  %5048 = vmatmul.mubr.msk.bf16.gmra.mxu0 %vm484_vm2, %v3719_v9  ;;  %v6235_v48 = vadd.f32 %v2117_v30, %v1771_v44  ;;  %v1776_v55 = vadd.f32 %v4823_v14, %v5972_v60  ;;  %5009 = vmatprep.mubr.msk.bf16.mxu1 %vm484_vm2, %v3348_v20  ;;  %v3365_v44 = vshrl.u32 %v6213_v15, 16  ;;  %v3725_v60 = vsel %vm984_vm3, %v3722_v43, %v3724_v34 }
 0x165   : > { %5051 = vmatprep.mubr.msk.bf16.mxu0 %vm484_vm2, %v3721_v31  ;;  %v1639_v58 = vpop.f32.mrf.mxu1  ;;  %v3363_v31 = vrot.slane %v3361_v22, 1  ;;  %v3356_v56 = vsel %vm319_vm1, %v3351_v37, %v3355_v49  ;;  %v3377_v14 = vshll.u32 %v6240_v17, 16  ;;  %v3371_v37 = vrot.slane %v3369_v3, 1 }
 0x166   : > { %v2130_v47 = vpop.f32.mrf.mxu0  ;;  %v6242_v46 = vadd.f32 %v4865_v25, %v1776_v55  ;;  %v1774_v40 = vadd.f32 %v1639_v58, %v5978_v61  ;;  %v3728_v58 = vrot.slane %v6240_v17, 1 }
 0x167   : > { %v4824_v13 = vpop.f32.mrf.mxu1  ;;  %v3364_v61 = vsel %vm319_vm1, %v3359_v27, %v3363_v31  ;;  %v3367_v55 = vor.u32 %v3365_v44, %v3363_v31 }
 0x168   : > { %v4866_v9 = vpop.f32.mrf.mxu0  ;;  %v6248_v23 = vadd.f32 %v2130_v47, %v1774_v40  ;;  %v1777_v20 = vadd.f32 %v4824_v13, %v5984_v38  ;;  %v3726_v47 = vrot.slane %v5169_v18, 1  ;;  %v3375_v13 = vor.u32 %v3373_v59, %v3371_v37 }
 0x169   : > { %v1642_v22 = vpop.f32.mrf.mxu1 }
 0x16a   : > { %v2133_v30 = vpop.f32.mrf.mxu0  ;;  %v6255_v15 = vadd.f32 %v4866_v9, %v1777_v20  ;;  %v1775_v43 = vadd.f32 %v1642_v22, %v5989_v57  ;;  %v5171_v9 = vld [vmem:[%s5228_s23 + $0xb4] ss:$0 sps:$4 sm:$0x11]   ;;  %v3727_v31 = vsel %vm984_vm3, %v3724_v34, %v3726_v47 }
 0x16b   : > { %v4827_v38 = vpop.f32.mrf.mxu1  ;;  %5010 = vmatmul.mubr.msk.bf16.gmra.mxu1 %vm484_vm2, %v3356_v56  ;;  %v3729_v56 = vsel %vm984_vm3, %v3726_v47, %v3728_v58  ;;  %v3385_v59 = vshll.u32 %v5171_v9, 16  ;;  %v3730_v47 = vrot.slane %v5171_v9, 1 }
 0x16c   : > { %v4869_v25 = vpop.f32.mrf.mxu0  ;;  %5052 = vmatmul.mubr.msk.bf16.gmra.mxu0 %vm484_vm2, %v3723_v19  ;;  %v6261_v27 = vadd.f32 %v2133_v30, %v1775_v43  ;;  %v1780_v40 = vadd.f32 %v4827_v38, %v6000_v33  ;;  %5013 = vmatprep.mubr.msk.bf16.mxu1 %vm484_vm2, %v3364_v61  ;;  %v3372_v30 = vsel %vm319_vm1, %v3367_v55, %v3371_v37  ;;  %v3381_v61 = vshrl.u32 %v6240_v17, 16 }
 0x16d   : > { %5055 = vmatprep.mubr.msk.bf16.mxu0 %vm484_vm2, %v3725_v60  ;;  %v1655_v19 = vpop.f32.mrf.mxu1  ;;  %v3379_v60 = vrot.slane %v3377_v14, 1  ;;  %v3387_v37 = vrot.slane %v3385_v59, 1  ;;  %v3731_v9 = vsel %vm984_vm3, %v3728_v58, %v3730_v47 }
 0x16e   : > { %v2146_v49 = vpop.f32.mrf.mxu0  ;;  %v6266_v18 = vadd.f32 %v4869_v25, %v1780_v40  ;;  %v1778_v20 = vadd.f32 %v1655_v19, %v6004_v1 }
 0x16f   : > { %v4828_v44 = vpop.f32.mrf.mxu1  ;;  %v3380_v1 = vsel %vm319_vm1, %v3375_v13, %v3379_v60  ;;  %v3383_v55 = vor.u32 %v3381_v61, %v3379_v60 }
 0x170   : > { %v4870_v57 = vpop.f32.mrf.mxu0  ;;  %v6272_v33 = vadd.f32 %v2146_v49, %v1778_v20  ;;  %v1781_v22 = vadd.f32 %v4828_v44, %v6011_v63  ;;  %v6669_v44 = vld [vmem:[#allocation4_spill] sm:$0xff] }
 0x171   : > { %v1658_v14 = vpop.f32.mrf.mxu1 }
 0x172   : > { %v2149_v3 = vpop.f32.mrf.mxu0  ;;  %v6278_v34 = vadd.f32 %v4870_v57, %v1781_v22  ;;  %v1779_v43 = vadd.f32 %v1658_v14, %v6018_v45 }
 0x173   : > { %v4831_v38 = vpop.f32.mrf.mxu1  ;;  %5014 = vmatmul.mubr.msk.bf16.gmra.mxu1 %vm484_vm2, %v3372_v30 }
 0x174   : > { %v4873_v25 = vpop.f32.mrf.mxu0  ;;  %5056 = vmatmul.mubr.msk.bf16.gmra.mxu0 %vm484_vm2, %v3727_v31  ;;  %v6283_v49 = vadd.f32 %v2149_v3, %v1779_v43  ;;  %v1784_v17 = vadd.f32 %v4831_v38, %v6027_v10  ;;  %5017 = vmatprep.mubr.msk.bf16.mxu1 %vm484_vm2, %v3380_v1  ;;  %v3388_v10 = vsel %vm319_vm1, %v3383_v55, %v3387_v37 }
 0x175   : > { %5059 = vmatprep.mubr.msk.bf16.mxu0 %vm484_vm2, %v3729_v56  ;;  %v1671_v40 = vpop.f32.mrf.mxu1 }
 0x176   : > { %v2162_v63 = vpop.f32.mrf.mxu0  ;;  %v6287_v57 = vadd.f32 %v4873_v25, %v1784_v17  ;;  %v1782_v45 = vadd.f32 %v1671_v40, %v6031_v29 }
 0x177   : > { %v4832_v13 = vpop.f32.mrf.mxu1 }
 0x178   : > { %v4874_v19 = vpop.f32.mrf.mxu0  ;;  %v6291_v31 = vadd.f32 %v2162_v63, %v1782_v45  ;;  %v1785_v3 = vadd.f32 %v4832_v13, %v6669_v44 }
 0x179   : > { %v1674_v60 = vpop.f32.mrf.mxu1 }
 0x17a   : > { %v2165_v20 = vpop.f32.mrf.mxu0  ;;  %v6296_v56 = vadd.f32 %v4874_v19, %v1785_v3  ;;  %v1783_v22 = vadd.f32 %v1674_v60, %v6046_v8 }
 0x17b   : > { %v4835_v61 = vpop.f32.mrf.mxu1  ;;  %5018 = vmatmul.mubr.msk.bf16.gmra.mxu1 %vm484_vm2, %v3388_v10 }
 0x17c   : > { %v4877_v30 = vpop.f32.mrf.mxu0  ;;  %5060 = vmatmul.mubr.msk.bf16.gmra.mxu0 %vm484_vm2, %v3731_v9  ;;  %v6300_v58 = vadd.f32 %v2165_v20, %v1783_v22  ;;  %v1788_v59 = vadd.f32 %v4835_v61, %v6053_v53 }
 0x17d   : > { %v1687_v14 = vpop.f32.mrf.mxu1 }
 0x17e   : > { %v2178_v29 = vpop.f32.mrf.mxu0  ;;  %v6303_v1 = vadd.f32 %v4877_v30, %v1788_v59  ;;  %v1786_v43 = vadd.f32 %v1687_v14, %v6058_v16 }
 0x17f   : > { %v4836_v47 = vpop.f32.mrf.mxu1 }
 0x180   : > { %v4878_v25 = vpop.f32.mrf.mxu0  ;;  %v6306_v63 = vadd.f32 %v2178_v29, %v1786_v43  ;;  %v1789_v8 = vadd.f32 %v4836_v47, %v6066_v12 }
 0x181   : > { %v1690_v17 = vpop.f32.mrf.mxu1 }
 0x182   : > { %v2181_v38 = vpop.f32.mrf.mxu0  ;;  %v6309_v37 = vadd.f32 %v4878_v25, %v1789_v8  ;;  %v1787_v40 = vadd.f32 %v1690_v17, %v6073_v35 }
 0x183   : > { %v4839_v19 = vpop.f32.mrf.mxu1 }
 0x184   : > { %v4881_v55 = vpop.f32.mrf.mxu0  ;;  %v6312_v45 = vadd.f32 %v2181_v38, %v1787_v40  ;;  %v1792_v9 = vadd.f32 %v4839_v19, %v6080_v7 }
 0x185   : > { %v1703_v13 = vpop.f32.mrf.mxu1 }
 0x186   : > { %v2194_v53 = vpop.f32.mrf.mxu0  ;;  %v6315_v20 = vadd.f32 %v4881_v55, %v1792_v9  ;;  %v1790_v44 = vadd.f32 %v1703_v13, %v6085_v6 }
 0x187   : > { %v4840_v3 = vpop.f32.mrf.mxu1 }
 0x188   : > { %v4882_v16 = vpop.f32.mrf.mxu0  ;;  %v6318_v10 = vadd.f32 %v2194_v53, %v1790_v44  ;;  %v1793_v60 = vadd.f32 %v4840_v3, %v6093_v36 }
 0x189   : > { %v1706_v30 = vpop.f32.mrf.mxu1 }
 0x18a   : > { %v2197_v12 = vpop.f32.mrf.mxu0  ;;  %v6321_v22 = vadd.f32 %v4882_v16, %v1793_v60  ;;  %v1791_v61 = vadd.f32 %v1706_v30, %v6100_v42 }
 0x18b   : > { %v4843_v29 = vpop.f32.mrf.mxu1 }
 0x18c   : > { %v4885_v35 = vpop.f32.mrf.mxu0  ;;  %v6324_v59 = vadd.f32 %v2197_v12, %v1791_v61  ;;  %v1796_v14 = vadd.f32 %v4843_v29, %v6107_v26 }
 0x18d   : > { %v1719_v25 = vpop.f32.mrf.mxu1 }
 0x18e   : > { %v2210_v7 = vpop.f32.mrf.mxu0  ;;  %v6327_v43 = vadd.f32 %v4885_v35, %v1796_v14  ;;  %v1794_v47 = vadd.f32 %v1719_v25, %v6112_v4 }
 0x18f   : > { %v4844_v38 = vpop.f32.mrf.mxu1 }
 0x190   : > { %v4886_v6 = vpop.f32.mrf.mxu0  ;;  %v6330_v8 = vadd.f32 %v2210_v7, %v1794_v47  ;;  %v1797_v17 = vadd.f32 %v4844_v38, %v6120_v21  ;;  %v6670_v38 = vld [vmem:[#allocation5_spill] sm:$0xff] }
 0x191   : > { %v1722_v55 = vpop.f32.mrf.mxu1 }
 0x192   : > { %v2213_v36 = vpop.f32.mrf.mxu0  ;;  %v6333_v40 = vadd.f32 %v4886_v6, %v1797_v17  ;;  %v1795_v19 = vadd.f32 %v1722_v55, %v6127_v50 }
 0x193   : > { %v4847_v53 = vpop.f32.mrf.mxu1 }
 0x194   : > { %v4889_v42 = vpop.f32.mrf.mxu0  ;;  %v6336_v9 = vadd.f32 %v2213_v36, %v1795_v19  ;;  %v1800_v13 = vadd.f32 %v4847_v53, %v6134_v11 }
 0x195   : > { %v1735_v16 = vpop.f32.mrf.mxu1 }
 0x196   : > { %v2226_v26 = vpop.f32.mrf.mxu0  ;;  %v6339_v44 = vadd.f32 %v4889_v42, %v1800_v13  ;;  %v1798_v3 = vadd.f32 %v1735_v16, %v6139_v5  ;;  %v6671_v42 = vld [vmem:[#allocation2_spill] sm:$0xff] }
 0x197   : > { %v4848_v12 = vpop.f32.mrf.mxu1 }
 0x198   : > { %v4890_v4 = vpop.f32.mrf.mxu0  ;;  %v6342_v60 = vadd.f32 %v2226_v26, %v1798_v3  ;;  %v1801_v30 = vadd.f32 %v4848_v12, %v6147_v39 }
 0x199   : > { %v1738_v35 = vpop.f32.mrf.mxu1 }
 0x19a   : > { %v2229_v21 = vpop.f32.mrf.mxu0  ;;  %v6345_v61 = vadd.f32 %v4890_v4, %v1801_v30  ;;  %v1799_v29 = vadd.f32 %v1738_v35, %v6154_v54 }
 0x19b   : > { %v4851_v7 = vpop.f32.mrf.mxu1 }
 0x19c   : > { %v4893_v50 = vpop.f32.mrf.mxu0  ;;  %v6348_v14 = vadd.f32 %v2229_v21, %v1799_v29  ;;  %v1804_v25 = vadd.f32 %v4851_v7, %v6161_v2 }
 0x19d   : > { %v1751_v6 = vpop.f32.mrf.mxu1 }
 0x19e   : > { %v2242_v11 = vpop.f32.mrf.mxu0  ;;  %v6351_v47 = vadd.f32 %v4893_v50, %v1804_v25  ;;  %v1802_v36 = vadd.f32 %v1751_v6, %v6670_v38 }
 0x19f   : > { %v4852_v17 = vpop.f32.mrf.mxu1 }
 0x1a0   : > { %v4894_v5 = vpop.f32.mrf.mxu0  ;;  %v6354_v55 = vadd.f32 %v2242_v11, %v1802_v36  ;;  %v1805_v19 = vadd.f32 %v4852_v17, %v6671_v42 }
 0x1a1   : > { %v1754_v53 = vpop.f32.mrf.mxu1 }
 0x1a2   : > { %v2245_v39 = vpop.f32.mrf.mxu0  ;;  %v6357_v26 = vadd.f32 %v4894_v5, %v1805_v19  ;;  %v1803_v13 = vadd.f32 %v1754_v53, %v6181_v32 }
 0x1a3   : > { %v4899_v16 = vpop.f32.mrf.mxu1 }
 0x1a4   : > { %v4941_v54 = vpop.f32.mrf.mxu0  ;;  %v6360_v4 = vadd.f32 %v2245_v39, %v1803_v13  ;;  %v2603_v3 = vadd.f32 %v4899_v16, %v6188_v62 }
 0x1a5   : > { %v2442_v12 = vpop.f32.mrf.mxu1 }
 0x1a6   : > { %v2880_v2 = vpop.f32.mrf.mxu0  ;;  %v6363_v30 = vadd.f32 %v4941_v54, %v2603_v3  ;;  %v2601_v35 = vadd.f32 %v2442_v12, %v6193_v28 }
 0x1a7   : > { %v4900_v50 = vpop.f32.mrf.mxu1 }
 0x1a8   : > { %v4942_v21 = vpop.f32.mrf.mxu0  ;;  %v6366_v7 = vadd.f32 %v2880_v2, %v2601_v35  ;;  %v2604_v11 = vadd.f32 %v4900_v50, %v6201_v41 }
 0x1a9   : > { %v2445_v25 = vpop.f32.mrf.mxu1 }
 0x1aa   : > { %v2883_v29 = vpop.f32.mrf.mxu0  ;;  %v6369_v6 = vadd.f32 %v4942_v21, %v2604_v11  ;;  %v2602_v5 = vadd.f32 %v2445_v25, %v6208_v0 }
 0x1ab   : > { %v4903_v38 = vpop.f32.mrf.mxu1 }
 0x1ac   : > { %v4945_v32 = vpop.f32.mrf.mxu0  ;;  %v6372_v36 = vadd.f32 %v2883_v29, %v2602_v5  ;;  %v2607_v17 = vadd.f32 %v4903_v38, %v6215_v52 }
 0x1ad   : > { %v2458_v39 = vpop.f32.mrf.mxu1 }
 0x1ae   : > { %v2896_v62 = vpop.f32.mrf.mxu0  ;;  %v6375_v42 = vadd.f32 %v4945_v32, %v2607_v17  ;;  %v2605_v19 = vadd.f32 %v2458_v39, %v6220_v51 }
 0x1af   : > { %v4904_v53 = vpop.f32.mrf.mxu1 }
 0x1b0   : > { %v4946_v28 = vpop.f32.mrf.mxu0  ;;  %v6378_v54 = vadd.f32 %v2896_v62, %v2605_v19  ;;  %v2608_v13 = vadd.f32 %v4904_v53, %v6228_v24 }
 0x1b1   : > { %v2461_v16 = vpop.f32.mrf.mxu1 }
 0x1b2   : > { %v2899_v41 = vpop.f32.mrf.mxu0  ;;  %v6381_v2 = vadd.f32 %v4946_v28, %v2608_v13  ;;  %v2606_v3 = vadd.f32 %v2461_v16, %v6235_v48 }
 0x1b3   : > { %v4907_v12 = vpop.f32.mrf.mxu1 }
 0x1b4   : > { %v4949_v0 = vpop.f32.mrf.mxu0  ;;  %v6384_v21 = vadd.f32 %v2899_v41, %v2606_v3  ;;  %v2611_v35 = vadd.f32 %v4907_v12, %v6242_v46 }
 0x1b5   : > { %v2474_v50 = vpop.f32.mrf.mxu1 }
 0x1b6   : > { %v2912_v52 = vpop.f32.mrf.mxu0  ;;  %v6387_v29 = vadd.f32 %v4949_v0, %v2611_v35  ;;  %v2609_v11 = vadd.f32 %v2474_v50, %v6248_v23 }
 0x1b7   : > { %v4908_v25 = vpop.f32.mrf.mxu1 }
 0x1b8   : > { %v4950_v51 = vpop.f32.mrf.mxu0  ;;  %v6390_v32 = vadd.f32 %v2912_v52, %v2609_v11  ;;  %v2612_v5 = vadd.f32 %v4908_v25, %v6255_v15 }
 0x1b9   : > { %v2477_v38 = vpop.f32.mrf.mxu1 }
 0x1ba   : > { %v2915_v24 = vpop.f32.mrf.mxu0  ;;  %v6393_v62 = vadd.f32 %v4950_v51, %v2612_v5  ;;  %v2610_v17 = vadd.f32 %v2477_v38, %v6261_v27 }
 0x1bb   : > { %v4911_v39 = vpop.f32.mrf.mxu1 }
 0x1bc   : > { %v4953_v48 = vpop.f32.mrf.mxu0  ;;  %v6396_v28 = vadd.f32 %v2915_v24, %v2610_v17  ;;  %v2615_v19 = vadd.f32 %v4911_v39, %v6266_v18 }
 0x1bd   : > { %v2490_v53 = vpop.f32.mrf.mxu1 }
 0x1be   : > { %v2928_v46 = vpop.f32.mrf.mxu0  ;;  %v6399_v41 = vadd.f32 %v4953_v48, %v2615_v19  ;;  %v2613_v13 = vadd.f32 %v2490_v53, %v6272_v33 }
 0x1bf   : > { %v4912_v16 = vpop.f32.mrf.mxu1 }
 0x1c0   : > { %v4954_v23 = vpop.f32.mrf.mxu0  ;;  %v6402_v0 = vadd.f32 %v2928_v46, %v2613_v13  ;;  %v2616_v3 = vadd.f32 %v4912_v16, %v6278_v34 }
 0x1c1   : > { %v2493_v12 = vpop.f32.mrf.mxu1 }
 0x1c2   : > { %v2931_v15 = vpop.f32.mrf.mxu0  ;;  %v6405_v52 = vadd.f32 %v4954_v23, %v2616_v3  ;;  %v2614_v35 = vadd.f32 %v2493_v12, %v6283_v49 }
 0x1c3   : > { %v4915_v50 = vpop.f32.mrf.mxu1 }
 0x1c4   : > { %v4957_v27 = vpop.f32.mrf.mxu0  ;;  %v6408_v51 = vadd.f32 %v2931_v15, %v2614_v35  ;;  %v2619_v11 = vadd.f32 %v4915_v50, %v6287_v57 }
 0x1c5   : > { %v2506_v25 = vpop.f32.mrf.mxu1 }
 0x1c6   : > { %v2944_v18 = vpop.f32.mrf.mxu0  ;;  %v6411_v24 = vadd.f32 %v4957_v27, %v2619_v11  ;;  %v2617_v5 = vadd.f32 %v2506_v25, %v6291_v31 }
 0x1c7   : > { %v4916_v38 = vpop.f32.mrf.mxu1 }
 0x1c8   : > { %v4958_v33 = vpop.f32.mrf.mxu0  ;;  %v6414_v48 = vadd.f32 %v2944_v18, %v2617_v5  ;;  %v2620_v17 = vadd.f32 %v4916_v38, %v6296_v56 }
 0x1c9   : > { %v2509_v39 = vpop.f32.mrf.mxu1 }
 0x1ca   : > { %v2947_v34 = vpop.f32.mrf.mxu0  ;;  %v6417_v46 = vadd.f32 %v4958_v33, %v2620_v17  ;;  %v2618_v19 = vadd.f32 %v2509_v39, %v6300_v58 }
 0x1cb   : > { %v4919_v53 = vpop.f32.mrf.mxu1 }
 0x1cc   : > { %v4961_v49 = vpop.f32.mrf.mxu0  ;;  %v6420_v23 = vadd.f32 %v2947_v34, %v2618_v19  ;;  %v2623_v13 = vadd.f32 %v4919_v53, %v6303_v1 }
 0x1cd   : > { %v2522_v16 = vpop.f32.mrf.mxu1 }
 0x1ce   : > { %v2960_v57 = vpop.f32.mrf.mxu0  ;;  %v6423_v15 = vadd.f32 %v4961_v49, %v2623_v13  ;;  %v2621_v3 = vadd.f32 %v2522_v16, %v6306_v63 }
 0x1cf   : > { %v4920_v12 = vpop.f32.mrf.mxu1 }
 0x1d0   : > { %v4962_v31 = vpop.f32.mrf.mxu0  ;;  %v6426_v27 = vadd.f32 %v2960_v57, %v2621_v3  ;;  %v2624_v35 = vadd.f32 %v4920_v12, %v6309_v37 }
 0x1d1   : > { %v2525_v50 = vpop.f32.mrf.mxu1 }
 0x1d2   : > { %v2963_v56 = vpop.f32.mrf.mxu0  ;;  %v6429_v18 = vadd.f32 %v4962_v31, %v2624_v35  ;;  %v2622_v11 = vadd.f32 %v2525_v50, %v6312_v45 }
 0x1d3   : > { %v4923_v25 = vpop.f32.mrf.mxu1 }
 0x1d4   : > { %v4965_v58 = vpop.f32.mrf.mxu0  ;;  %v6432_v33 = vadd.f32 %v2963_v56, %v2622_v11  ;;  %v2627_v5 = vadd.f32 %v4923_v25, %v6315_v20 }
 0x1d5   : > { %v2538_v38 = vpop.f32.mrf.mxu1 }
 0x1d6   : > { %v2976_v1 = vpop.f32.mrf.mxu0  ;;  %v6435_v34 = vadd.f32 %v4965_v58, %v2627_v5  ;;  %v2625_v17 = vadd.f32 %v2538_v38, %v6318_v10 }
 0x1d7   : > { %v4924_v39 = vpop.f32.mrf.mxu1 }
 0x1d8   : > { %v4966_v63 = vpop.f32.mrf.mxu0  ;;  %v6438_v49 = vadd.f32 %v2976_v1, %v2625_v17  ;;  %v2628_v19 = vadd.f32 %v4924_v39, %v6321_v22 }
 0x1d9   : > { %v2541_v53 = vpop.f32.mrf.mxu1 }
 0x1da   : > { %v2979_v37 = vpop.f32.mrf.mxu0  ;;  %v6441_v57 = vadd.f32 %v4966_v63, %v2628_v19  ;;  %v2626_v13 = vadd.f32 %v2541_v53, %v6324_v59 }
 0x1db   : > { %v4927_v16 = vpop.f32.mrf.mxu1 }
 0x1dc   : > { %v4969_v45 = vpop.f32.mrf.mxu0  ;;  %v6444_v31 = vadd.f32 %v2979_v37, %v2626_v13  ;;  %v2631_v3 = vadd.f32 %v4927_v16, %v6327_v43 }
 0x1dd   : > { %v2554_v12 = vpop.f32.mrf.mxu1 }
 0x1de   : > { %v2992_v20 = vpop.f32.mrf.mxu0  ;;  %v6447_v56 = vadd.f32 %v4969_v45, %v2631_v3  ;;  %v2629_v35 = vadd.f32 %v2554_v12, %v6330_v8 }
 0x1df   : > { %v4928_v50 = vpop.f32.mrf.mxu1 }
 0x1e0   : > { %v4970_v10 = vpop.f32.mrf.mxu0  ;;  %v6450_v58 = vadd.f32 %v2992_v20, %v2629_v35  ;;  %v2632_v11 = vadd.f32 %v4928_v50, %v6333_v40 }
 0x1e1   : > { %v2557_v25 = vpop.f32.mrf.mxu1 }
 0x1e2   : > { %v2995_v22 = vpop.f32.mrf.mxu0  ;;  %v6453_v1 = vadd.f32 %v4970_v10, %v2632_v11  ;;  %v2630_v5 = vadd.f32 %v2557_v25, %v6336_v9 }
 0x1e3   : > { %v4931_v38 = vpop.f32.mrf.mxu1 }
 0x1e4   : > { %v4973_v59 = vpop.f32.mrf.mxu0  ;;  %v6456_v63 = vadd.f32 %v2995_v22, %v2630_v5  ;;  %v2635_v17 = vadd.f32 %v4931_v38, %v6339_v44 }
 0x1e5   : > { %v2570_v39 = vpop.f32.mrf.mxu1 }
 0x1e6   : > { %v3008_v43 = vpop.f32.mrf.mxu0  ;;  %v6459_v37 = vadd.f32 %v4973_v59, %v2635_v17  ;;  %v2633_v19 = vadd.f32 %v2570_v39, %v6342_v60 }
 0x1e7   : > { %v4932_v53 = vpop.f32.mrf.mxu1 }
 0x1e8   : > { %v4974_v8 = vpop.f32.mrf.mxu0  ;;  %v6462_v45 = vadd.f32 %v3008_v43, %v2633_v19  ;;  %v2636_v13 = vadd.f32 %v4932_v53, %v6345_v61 }
 0x1e9   : > { %v2573_v16 = vpop.f32.mrf.mxu1 }
 0x1ea   : > { %v3011_v40 = vpop.f32.mrf.mxu0  ;;  %v6465_v20 = vadd.f32 %v4974_v8, %v2636_v13  ;;  %v2634_v3 = vadd.f32 %v2573_v16, %v6348_v14 }
 0x1eb   : > { %v4935_v12 = vpop.f32.mrf.mxu1 }
 0x1ec   : > { %v4977_v9 = vpop.f32.mrf.mxu0  ;;  %v6468_v10 = vadd.f32 %v3011_v40, %v2634_v3  ;;  %v2639_v35 = vadd.f32 %v4935_v12, %v6351_v47 }
 0x1ed   : > { %v2586_v50 = vpop.f32.mrf.mxu1 }
 0x1ee   : > { %v3024_v44 = vpop.f32.mrf.mxu0  ;;  %v6471_v22 = vadd.f32 %v4977_v9, %v2639_v35  ;;  %v2637_v11 = vadd.f32 %v2586_v50, %v6354_v55  ;;  %v6487_v55 = vld [vmem:[%s6658_s2] ss:$0 sm:$0xff] }
 0x1ef   : > { %v4936_v61 = vpop.f32.mrf.mxu1 }
 0x1f0   : > { %v4978_v60 = vpop.f32.mrf.mxu0  ;;  %v6474_v59 = vadd.f32 %v3024_v44, %v2637_v11  ;;  %v2640_v5 = vadd.f32 %v4936_v61, %v6357_v26 }
 0x1f1   : > { %v2589_v14 = vpop.f32.mrf.mxu1 }
 0x1f2   : > { %v3027_v25 = vpop.f32.mrf.mxu0  ;;  %v6477_v43 = vadd.f32 %v4978_v60, %v2640_v5  ;;  %v2638_v17 = vadd.f32 %v2589_v14, %v6360_v4 }
 0x1f3   : > { %v4983_v47 = vpop.f32.mrf.mxu1 }
 0x1f4   : > { %v5025_v38 = vpop.f32.mrf.mxu0  ;;  %v6480_v8 = vadd.f32 %v3027_v25, %v2638_v17  ;;  %v3647_v19 = vadd.f32 %v4983_v47, %v6363_v30 }
 0x1f5   : > { %v3486_v53 = vpop.f32.mrf.mxu1 }
 0x1f6   : > { %v3829_v39 = vpop.f32.mrf.mxu0  ;;  %v3990_v40 = vadd.f32 %v5025_v38, %v3647_v19  ;;  %v3645_v13 = vadd.f32 %v3486_v53, %v6366_v7 }
 0x1f7   : > { %v4984_v16 = vpop.f32.mrf.mxu1 }
 0x1f8   : > { %v5026_v26 = vpop.f32.mrf.mxu0  ;;  %v4037_v4 = vadd.f32 %v6487_v55, %v3990_v40  ;;  %v3988_v3 = vadd.f32 %v3829_v39, %v3645_v13  ;;  %v3648_v12 = vadd.f32 %v4984_v16, %v6369_v6 }
 0x1f9   : > { %v3489_v30 = vpop.f32.mrf.mxu1 }
 0x1fa   : > { %v3832_v9 = vpop.f32.mrf.mxu0  ;;  %v4077_v35 = vmax.f32 %v4037_v4, 0.0  ;;  %v4035_v7 = vadd.f32 %v6487_v55, %v3988_v3  ;;  %v3991_v50 = vadd.f32 %v5026_v26, %v3648_v12  ;;  %v3646_v60 = vadd.f32 %v3489_v30, %v6372_v36 }
 0x1fb   : > { %v4987_v11 = vpop.f32.mrf.mxu1 }
 0x1fc   : > { %v5029_v44 = vpop.f32.mrf.mxu0  ;;  %4118 = vst.msk [vmem:[%s6495_s13 + $0x10] sm:$0xff] %vm4115_vm7, %v4077_v35  ;;  %v4075_v6 = vmax.f32 %v4035_v7, 0.0  ;;  %v4038_v25 = vadd.f32 %v6487_v55, %v3991_v50  ;;  %v3989_v5 = vadd.f32 %v3832_v9, %v3646_v60  ;;  %v3651_v14 = vadd.f32 %v4987_v11, %v6375_v42 }
 0x1fd   : > { %v3502_v38 = vpop.f32.mrf.mxu1 }
 0x1fe   : > { %v3845_v61 = vpop.f32.mrf.mxu0  ;;  %4116 = vst.msk [vmem:[%s6495_s13] sm:$0xff] %vm4115_vm7, %v4075_v6  ;;  %v4078_v47 = vmax.f32 %v4038_v25, 0.0  ;;  %v4036_v39 = vadd.f32 %v6487_v55, %v3989_v5  ;;  %v3994_v36 = vadd.f32 %v5029_v44, %v3651_v14  ;;  %v3649_v19 = vadd.f32 %v3502_v38, %v6378_v54 }
 0x1ff   : > { %v4988_v53 = vpop.f32.mrf.mxu1 }
 0x200   : > { %v5030_v17 = vpop.f32.mrf.mxu0  ;;  %4119 = vst.msk [vmem:[%s6495_s13 + $0x18] sm:$0xff] %vm4115_vm7, %v4078_v47  ;;  %v4076_v40 = vmax.f32 %v4036_v39, 0.0  ;;  %v4041_v13 = vadd.f32 %v6487_v55, %v3994_v36  ;;  %v3992_v42 = vadd.f32 %v3845_v61, %v3649_v19  ;;  %v3652_v16 = vadd.f32 %v4988_v53, %v6381_v2 }
 0x201   : > { %v3505_v9 = vpop.f32.mrf.mxu1 }
 0x202   : > { %v3848_v26 = vpop.f32.mrf.mxu0  ;;  %4117 = vst.msk [vmem:[%s6495_s13 + $0x8] sm:$0xff] %vm4115_vm7, %v4076_v40  ;;  %v4081_v3 = vmax.f32 %v4041_v13, 0.0  ;;  %v4039_v12 = vadd.f32 %v6487_v55, %v3992_v42  ;;  %v3995_v54 = vadd.f32 %v5030_v17, %v3652_v16  ;;  %v3650_v30 = vadd.f32 %v3505_v9, %v6384_v21 }
 0x203   : > { %v4991_v44 = vpop.f32.mrf.mxu1 }
 0x204   : > { %v5033_v4 = vpop.f32.mrf.mxu0  ;;  %4122 = vst.msk [vmem:[%s6495_s13 + $0x30] sm:$0xff] %vm4115_vm7, %v4081_v3  ;;  %v4079_v7 = vmax.f32 %v4039_v12, 0.0  ;;  %v4042_v50 = vadd.f32 %v6487_v55, %v3995_v54  ;;  %v3993_v2 = vadd.f32 %v3848_v26, %v3650_v30  ;;  %v3655_v60 = vadd.f32 %v4991_v44, %v6387_v29 }
 0x205   : > { %v3518_v11 = vpop.f32.mrf.mxu1 }
 0x206   : > { %v3861_v35 = vpop.f32.mrf.mxu0  ;;  %4120 = vst.msk [vmem:[%s6495_s13 + $0x20] sm:$0xff] %vm4115_vm7, %v4079_v7  ;;  %v4082_v6 = vmax.f32 %v4042_v50, 0.0  ;;  %v4040_v25 = vadd.f32 %v6487_v55, %v3993_v2  ;;  %v3998_v21 = vadd.f32 %v5033_v4, %v3655_v60  ;;  %v3653_v5 = vadd.f32 %v3518_v11, %v6390_v32 }
 0x207   : > { %v4992_v14 = vpop.f32.mrf.mxu1 }
 0x208   : > { %v5034_v61 = vpop.f32.mrf.mxu0  ;;  %4123 = vst.msk [vmem:[%s6495_s13 + $0x38] sm:$0xff] %vm4115_vm7, %v4082_v6  ;;  %v4080_v17 = vmax.f32 %v4040_v25, 0.0  ;;  %v4045_v47 = vadd.f32 %v6487_v55, %v3998_v21  ;;  %v3996_v29 = vadd.f32 %v3861_v35, %v3653_v5  ;;  %v3656_v39 = vadd.f32 %v4992_v14, %v6393_v62 }
 0x209   : > { %v3521_v36 = vpop.f32.mrf.mxu1 }
 0x20a   : > { %v3864_v38 = vpop.f32.mrf.mxu0  ;;  %4121 = vst.msk [vmem:[%s6495_s13 + $0x28] sm:$0xff] %vm4115_vm7, %v4080_v17  ;;  %v4085_v53 = vmax.f32 %v4045_v47, 0.0  ;;  %v4043_v26 = vadd.f32 %v6487_v55, %v3996_v29  ;;  %v3999_v32 = vadd.f32 %v5034_v61, %v3656_v39  ;;  %v3654_v40 = vadd.f32 %v3521_v36, %v6396_v28 }
 0x20b   : > { %v4995_v13 = vpop.f32.mrf.mxu1 }
 0x20c   : > { %v5037_v19 = vpop.f32.mrf.mxu0  ;;  %4126 = vst.msk [vmem:[%s6495_s13 + $0x50] sm:$0xff] %vm4115_vm7, %v4085_v53  ;;  %v4083_v16 = vmax.f32 %v4043_v26, 0.0  ;;  %v4046_v9 = vadd.f32 %v6487_v55, %v3999_v32  ;;  %v3997_v62 = vadd.f32 %v3864_v38, %v3654_v40  ;;  %v3659_v4 = vadd.f32 %v4995_v13, %v6399_v41 }
 0x20d   : > { %v3534_v3 = vpop.f32.mrf.mxu1 }
 0x20e   : > { %v3877_v42 = vpop.f32.mrf.mxu0  ;;  %4124 = vst.msk [vmem:[%s6495_s13 + $0x40] sm:$0xff] %vm4115_vm7, %v4083_v16  ;;  %v4086_v54 = vmax.f32 %v4046_v9, 0.0  ;;  %v4044_v30 = vadd.f32 %v6487_v55, %v3997_v62  ;;  %v4002_v28 = vadd.f32 %v5037_v19, %v3659_v4  ;;  %v3657_v44 = vadd.f32 %v3534_v3, %v6402_v0 }
 0x20f   : > { %v4996_v35 = vpop.f32.mrf.mxu1 }
 0x210   : > { %v5038_v12 = vpop.f32.mrf.mxu0  ;;  %4127 = vst.msk [vmem:[%s6495_s13 + $0x58] sm:$0xff] %vm4115_vm7, %v4086_v54  ;;  %v4084_v50 = vmax.f32 %v4044_v30, 0.0  ;;  %v4049_v2 = vadd.f32 %v6487_v55, %v4002_v28  ;;  %v4000_v41 = vadd.f32 %v3877_v42, %v3657_v44  ;;  %v3660_v60 = vadd.f32 %v4996_v35, %v6405_v52 }
 0x211   : > { %v3537_v11 = vpop.f32.mrf.mxu1 }
 0x212   : > { %v3880_v7 = vpop.f32.mrf.mxu0  ;;  %4125 = vst.msk [vmem:[%s6495_s13 + $0x48] sm:$0xff] %vm4115_vm7, %v4084_v50  ;;  %v4089_v6 = vmax.f32 %v4049_v2, 0.0  ;;  %v4047_v25 = vadd.f32 %v6487_v55, %v4000_v41  ;;  %v4003_v0 = vadd.f32 %v5038_v12, %v3660_v60  ;;  %v3658_v21 = vadd.f32 %v3537_v11, %v6408_v51 }
 0x213   : > { %v4999_v5 = vpop.f32.mrf.mxu1 }
 0x214   : > { %v5041_v61 = vpop.f32.mrf.mxu0  ;;  %4130 = vst.msk [vmem:[%s6495_s13 + $0x70] sm:$0xff] %vm4115_vm7, %v4089_v6  ;;  %v4087_v38 = vmax.f32 %v4047_v25, 0.0  ;;  %v4050_v17 = vadd.f32 %v6487_v55, %v4003_v0  ;;  %v4001_v52 = vadd.f32 %v3880_v7, %v3658_v21  ;;  %v3663_v47 = vadd.f32 %v4999_v5, %v6411_v24 }
 0x215   : > { %v3550_v29 = vpop.f32.mrf.mxu1 }
 0x216   : > { %v3893_v14 = vpop.f32.mrf.mxu0  ;;  %4128 = vst.msk [vmem:[%s6495_s13 + $0x60] sm:$0xff] %vm4115_vm7, %v4087_v38  ;;  %v4090_v36 = vmax.f32 %v4050_v17, 0.0  ;;  %v4048_v19 = vadd.f32 %v6487_v55, %v4001_v52  ;;  %v4006_v51 = vadd.f32 %v5041_v61, %v3663_v47  ;;  %v3661_v53 = vadd.f32 %v3550_v29, %v6414_v48 }
 0x217   : > { %v5000_v26 = vpop.f32.mrf.mxu1 }
 0x218   : > { %v5042_v39 = vpop.f32.mrf.mxu0  ;;  %4131 = vst.msk [vmem:[%s6495_s13 + $0x78] sm:$0xff] %vm4115_vm7, %v4090_v36  ;;  %v4088_v40 = vmax.f32 %v4048_v19, 0.0  ;;  %v4053_v13 = vadd.f32 %v6487_v55, %v4006_v51  ;;  %v4004_v24 = vadd.f32 %v3893_v14, %v3661_v53  ;;  %v3664_v42 = vadd.f32 %v5000_v26, %v6417_v46 }
 0x219   : > { %v3553_v16 = vpop.f32.mrf.mxu1 }
 0x21a   : > { %v3896_v32 = vpop.f32.mrf.mxu0  ;;  %4129 = vst.msk [vmem:[%s6495_s13 + $0x68] sm:$0xff] %vm4115_vm7, %v4088_v40  ;;  %v4093_v62 = vmax.f32 %v4053_v13, 0.0  ;;  %v4051_v4 = vadd.f32 %v6487_v55, %v4004_v24  ;;  %v4007_v48 = vadd.f32 %v5042_v39, %v3664_v42  ;;  %v3662_v3 = vadd.f32 %v3553_v16, %v6420_v23 }
 0x21b   : > { %v5003_v12 = vpop.f32.mrf.mxu1 }
 0x21c   : > { %v5045_v9 = vpop.f32.mrf.mxu0  ;;  %4134 = vst.msk [vmem:[%s6495_s13 + $0x90] sm:$0xff] %vm4115_vm7, %v4093_v62  ;;  %v4091_v30 = vmax.f32 %v4051_v4, 0.0  ;;  %v4054_v28 = vadd.f32 %v6487_v55, %v4007_v48  ;;  %v4005_v46 = vadd.f32 %v3896_v32, %v3662_v3  ;;  %v3667_v44 = vadd.f32 %v5003_v12, %v6423_v15 }
 0x21d   : > { %v3566_v35 = vpop.f32.mrf.mxu1 }
 0x21e   : > { %v3909_v54 = vpop.f32.mrf.mxu0  ;;  %4132 = vst.msk [vmem:[%s6495_s13 + $0x80] sm:$0xff] %vm4115_vm7, %v4091_v30  ;;  %v4094_v50 = vmax.f32 %v4054_v28, 0.0  ;;  %v4052_v2 = vadd.f32 %v6487_v55, %v4005_v46  ;;  %v4010_v23 = vadd.f32 %v5045_v9, %v3667_v44  ;;  %v3665_v41 = vadd.f32 %v3566_v35, %v6426_v27 }
 0x21f   : > { %v5004_v60 = vpop.f32.mrf.mxu1 }
 0x220   : > { %v5046_v7 = vpop.f32.mrf.mxu0  ;;  %4135 = vst.msk [vmem:[%s6495_s13 + $0x98] sm:$0xff] %vm4115_vm7, %v4094_v50  ;;  %v4092_v61 = vmax.f32 %v4052_v2, 0.0  ;;  %v4057_v6 = vadd.f32 %v6487_v55, %v4010_v23  ;;  %v4008_v15 = vadd.f32 %v3909_v54, %v3665_v41  ;;  %v3668_v25 = vadd.f32 %v5004_v60, %v6429_v18 }
 0x221   : > { %v3569_v0 = vpop.f32.mrf.mxu1 }
 0x222   : > { %v3912_v11 = vpop.f32.mrf.mxu0  ;;  %4133 = vst.msk [vmem:[%s6495_s13 + $0x88] sm:$0xff] %vm4115_vm7, %v4092_v61  ;;  %v4097_v5 = vmax.f32 %v4057_v6, 0.0  ;;  %v4055_v14 = vadd.f32 %v6487_v55, %v4008_v15  ;;  %v4011_v27 = vadd.f32 %v5046_v7, %v3668_v25  ;;  %v3666_v38 = vadd.f32 %v3569_v0, %v6432_v33 }
 0x223   : > { %v5007_v17 = vpop.f32.mrf.mxu1 }
 0x224   : > { %v5049_v21 = vpop.f32.mrf.mxu0  ;;  %4138 = vst.msk [vmem:[%s6495_s13 + $0xb0] sm:$0xff] %vm4115_vm7, %v4097_v5  ;;  %v4095_v47 = vmax.f32 %v4055_v14, 0.0  ;;  %v4058_v29 = vadd.f32 %v6487_v55, %v4011_v27  ;;  %v4009_v18 = vadd.f32 %v3912_v11, %v3666_v38  ;;  %v3671_v39 = vadd.f32 %v5007_v17, %v6435_v34 }
 0x225   : > { %v3582_v36 = vpop.f32.mrf.mxu1 }
 0x226   : > { %v3925_v52 = vpop.f32.mrf.mxu0  ;;  %4136 = vst.msk [vmem:[%s6495_s13 + $0xa0] sm:$0xff] %vm4115_vm7, %v4095_v47  ;;  %v4098_v51 = vmax.f32 %v4058_v29, 0.0  ;;  %v4056_v53 = vadd.f32 %v6487_v55, %v4009_v18  ;;  %v4014_v33 = vadd.f32 %v5049_v21, %v3671_v39  ;;  %v3669_v26 = vadd.f32 %v3582_v36, %v6438_v49 }
 0x227   : > { %v5008_v32 = vpop.f32.mrf.mxu1 }
 0x228   : > { %v5050_v19 = vpop.f32.mrf.mxu0  ;;  %4139 = vst.msk [vmem:[%s6495_s13 + $0xb8] sm:$0xff] %vm4115_vm7, %v4098_v51  ;;  %v4096_v13 = vmax.f32 %v4056_v53, 0.0  ;;  %v4061_v24 = vadd.f32 %v6487_v55, %v4014_v33  ;;  %v4012_v34 = vadd.f32 %v3925_v52, %v3669_v26  ;;  %v3672_v42 = vadd.f32 %v5008_v32, %v6441_v57 }
 0x229   : > { %v3585_v16 = vpop.f32.mrf.mxu1 }
 0x22a   : > { %v3928_v40 = vpop.f32.mrf.mxu0  ;;  %4137 = vst.msk [vmem:[%s6495_s13 + $0xa8] sm:$0xff] %vm4115_vm7, %v4096_v13  ;;  %v4101_v62 = vmax.f32 %v4061_v24, 0.0  ;;  %v4059_v4 = vadd.f32 %v6487_v55, %v4012_v34  ;;  %v4015_v49 = vadd.f32 %v5050_v19, %v3672_v42  ;;  %v3670_v48 = vadd.f32 %v3585_v16, %v6444_v31 }
 0x22b   : > { %v5011_v3 = vpop.f32.mrf.mxu1 }
 0x22c   : > { %v5053_v9 = vpop.f32.mrf.mxu0  ;;  %4142 = vst.msk [vmem:[%s6495_s13 + $0xd0] sm:$0xff] %vm4115_vm7, %v4101_v62  ;;  %v4099_v54 = vmax.f32 %v4059_v4, 0.0  ;;  %v4062_v30 = vadd.f32 %v6487_v55, %v4015_v49  ;;  %v4013_v57 = vadd.f32 %v3928_v40, %v3670_v48  ;;  %v3675_v28 = vadd.f32 %v5011_v3, %v6447_v56 }
 0x22d   : > { %v3598_v46 = vpop.f32.mrf.mxu1 }
 0x22e   : > { %v3941_v12 = vpop.f32.mrf.mxu0  ;;  %4140 = vst.msk [vmem:[%s6495_s13 + $0xc0] sm:$0xff] %vm4115_vm7, %v4099_v54  ;;  %v4102_v35 = vmax.f32 %v4062_v30, 0.0  ;;  %v4060_v7 = vadd.f32 %v6487_v55, %v4013_v57  ;;  %v4018_v31 = vadd.f32 %v5053_v9, %v3675_v28  ;;  %v3673_v50 = vadd.f32 %v3598_v46, %v6450_v58 }
 0x22f   : > { %v5012_v2 = vpop.f32.mrf.mxu1 }
 0x230   : > { %v5054_v44 = vpop.f32.mrf.mxu0  ;;  %4143 = vst.msk [vmem:[%s6495_s13 + $0xd8] sm:$0xff] %vm4115_vm7, %v4102_v35  ;;  %v4100_v41 = vmax.f32 %v4060_v7, 0.0  ;;  %v4065_v60 = vadd.f32 %v6487_v55, %v4018_v31  ;;  %v4016_v56 = vadd.f32 %v3941_v12, %v3673_v50  ;;  %v3676_v11 = vadd.f32 %v5012_v2, %v6453_v1 }
 0x231   : > { %v3601_v61 = vpop.f32.mrf.mxu1 }
 0x232   : > { %v3944_v23 = vpop.f32.mrf.mxu0  ;;  %4141 = vst.msk [vmem:[%s6495_s13 + $0xc8] sm:$0xff] %vm4115_vm7, %v4100_v41  ;;  %v4105_v15 = vmax.f32 %v4065_v60, 0.0  ;;  %v4063_v25 = vadd.f32 %v6487_v55, %v4016_v56  ;;  %v4019_v58 = vadd.f32 %v5054_v44, %v3676_v11  ;;  %v3674_v0 = vadd.f32 %v3601_v61, %v6456_v63 }
 0x233   : > { %v5015_v21 = vpop.f32.mrf.mxu1 }
 0x234   : > { %v5057_v6 = vpop.f32.mrf.mxu0  ;;  %4146 = vst.msk [vmem:[%s6495_s13 + $0xf0] sm:$0xff] %vm4115_vm7, %v4105_v15  ;;  %v4103_v14 = vmax.f32 %v4063_v25, 0.0  ;;  %v4066_v27 = vadd.f32 %v6487_v55, %v4019_v58  ;;  %v4017_v1 = vadd.f32 %v3944_v23, %v3674_v0  ;;  %v3679_v38 = vadd.f32 %v5015_v21, %v6459_v37 }
 0x235   : > { %v3614_v17 = vpop.f32.mrf.mxu1 }
 0x236   : > { %v3957_v5 = vpop.f32.mrf.mxu0  ;;  %4144 = vst.msk [vmem:[%s6495_s13 + $0xe0] sm:$0xff] %vm4115_vm7, %v4103_v14  ;;  %v4106_v47 = vmax.f32 %v4066_v27, 0.0  ;;  %v4064_v29 = vadd.f32 %v6487_v55, %v4017_v1  ;;  %v4022_v63 = vadd.f32 %v5057_v6, %v3679_v38  ;;  %v3677_v18 = vadd.f32 %v3614_v17, %v6462_v45 }
 0x237   : > { %v5016_v39 = vpop.f32.mrf.mxu1 }
 0x238   : > { %v5058_v52 = vpop.f32.mrf.mxu0  ;;  %4147 = vst.msk [vmem:[%s6495_s13 + $0xf8] sm:$0xff] %vm4115_vm7, %v4106_v47  ;;  %v4104_v19 = vmax.f32 %v4064_v29, 0.0  ;;  %v4069_v51 = vadd.f32 %v6487_v55, %v4022_v63  ;;  %v4020_v37 = vadd.f32 %v3957_v5, %v3677_v18  ;;  %v3680_v53 = vadd.f32 %v5016_v39, %v6465_v20 }
 0x239   : > { %v3617_v33 = vpop.f32.mrf.mxu1 }
 0x23a   : > { %v3960_v36 = vpop.f32.mrf.mxu0  ;;  %4145 = vst.msk [vmem:[%s6495_s13 + $0xe8] sm:$0xff] %vm4115_vm7, %v4104_v19  ;;  %v4109_v32 = vmax.f32 %v4069_v51, 0.0  ;;  %v4067_v40 = vadd.f32 %v6487_v55, %v4020_v37  ;;  %v4023_v45 = vadd.f32 %v5058_v52, %v3680_v53  ;;  %v3678_v13 = vadd.f32 %v3617_v33, %v6468_v10 }
 0x23b   : > { %v5019_v24 = vpop.f32.mrf.mxu1 }
 0x23c   : > { %v5061_v26 = vpop.f32.mrf.mxu0  ;;  %4150 = vst.msk [vmem:[%s6495_s13 + $0x110] sm:$0xff] %vm4115_vm7, %v4109_v32  ;;  %v4107_v42 = vmax.f32 %v4067_v40, 0.0  ;;  %v4070_v16 = vadd.f32 %v6487_v55, %v4023_v45  ;;  %v4021_v20 = vadd.f32 %v3960_v36, %v3678_v13  ;;  %v3683_v9 = vadd.f32 %v5019_v24, %v6471_v22 }
 0x23d   : > { %v3630_v62 = vpop.f32.mrf.mxu1 }
 0x23e   : > { %v3973_v34 = vpop.f32.mrf.mxu0  ;;  %4148 = vst.msk [vmem:[%s6495_s13 + $0x100] sm:$0xff] %vm4115_vm7, %v4107_v42  ;;  %v4110_v49 = vmax.f32 %v4070_v16, 0.0  ;;  %v4068_v48 = vadd.f32 %v6487_v55, %v4021_v20  ;;  %v4026_v10 = vadd.f32 %v5061_v26, %v3683_v9  ;;  %v3681_v3 = vadd.f32 %v3630_v62, %v6474_v59 }
 0x23f   : > { %v5020_v12 = vpop.f32.mrf.mxu1 }
 0x240   : > { %v5062_v4 = vpop.f32.mrf.mxu0  ;;  %4151 = vst.msk [vmem:[%s6495_s13 + $0x118] sm:$0xff] %vm4115_vm7, %v4110_v49  ;;  %v4108_v54 = vmax.f32 %v4068_v48, 0.0  ;;  %v4073_v30 = vadd.f32 %v6487_v55, %v4026_v10  ;;  %v4024_v22 = vadd.f32 %v3973_v34, %v3681_v3  ;;  %v3684_v57 = vadd.f32 %v5020_v12, %v6477_v43 }
 0x241   : > { %v3633_v28 = vpop.f32.mrf.mxu1 }
 0x242   : > { %v3976_v46 = vpop.f32.mrf.mxu0  ;;  %4149 = vst.msk [vmem:[%s6495_s13 + $0x108] sm:$0xff] %vm4115_vm7, %v4108_v54  ;;  %v4113_v44 = vmax.f32 %v4073_v30, 0.0  ;;  %v4071_v35 = vadd.f32 %v6487_v55, %v4024_v22  ;;  %v4027_v59 = vadd.f32 %v5062_v4, %v3684_v57  ;;  %v3682_v7 = vadd.f32 %v3633_v28, %v6480_v8 }
 0x244   : > { %4154 = vst.msk [vmem:[%s6495_s13 + $0x130] sm:$0xff] %vm4115_vm7, %v4113_v44  ;;  %v4111_v31 = vmax.f32 %v4071_v35, 0.0  ;;  %v4074_v50 = vadd.f32 %v6487_v55, %v4027_v59  ;;  %v4025_v2 = vadd.f32 %v3976_v46, %v3682_v7 }
 0x246   : > { %4152 = vst.msk [vmem:[%s6495_s13 + $0x120] sm:$0xff] %vm4115_vm7, %v4111_v31  ;;  %v4114_v43 = vmax.f32 %v4074_v50, 0.0  ;;  %v4072_v23 = vadd.f32 %v6487_v55, %v4025_v2 }
 0x248   : > { %4155 = vst.msk [vmem:[%s6495_s13 + $0x138] sm:$0xff] %vm4115_vm7, %v4114_v43  ;;  %v4112_v41 = vmax.f32 %v4072_v23, 0.0 }
 0x24a   : > { %4153 = vst.msk [vmem:[%s6495_s13 + $0x128] sm:$0xff] %vm4115_vm7, %v4112_v41 }
 0x24b PF: > { %s13_s12 = sadd.s32 1, %s5178_s12  }
 0x24c   : > { %p10_p4 = scmp.ge.s32.totalorder %s13_s12, 4  }
 0x24e   :  { %12 = sbr.rel (!%p10_p4) target bundleno = 1 (0x1), region = 70 }

</bundles_post_ra>
